<compile_context>
chip_gen: v6e
topology: v6e:2x2x1
jax: 0.10.0
libtpu: 0.0.40
codegen_flags: <defaults>
</compile_context>

<pallas_src>
import jax
import jax.numpy as jnp
from jax.experimental import pallas as pl
from jax.experimental.pallas import tpu as pltpu


def _disc_kernel(x_ref, w1_ref, b1_ref, w2_ref, b2_ref, w3_ref, b3_ref, o_ref):
    # In-kernel bf16 cast (VPU op, hidden under the MXU) — x arrives as f32 so
    # there is no extra HBM pass in the wrapper. No-op if x is already bf16.
    x_bf = x_ref[...].astype(jnp.bfloat16)
    # Layer 1: Linear(D -> 512) + ReLU. bf16 operands, f32 accumulation.
    h1 = jnp.dot(x_bf, w1_ref[...], preferred_element_type=jnp.float32)
    h1 = jnp.maximum(h1 + b1_ref[...], 0.0)
    # Layer 2: Linear(512 -> 384) + ReLU.
    h2 = jnp.dot(h1.astype(jnp.bfloat16), w2_ref[...],
                 preferred_element_type=jnp.float32)
    h2 = jnp.maximum(h2 + b2_ref[...], 0.0)
    # Layer 3: Linear(384 -> 1). An N=1 MXU matmul wastes a full systolic
    # pass, so do it as a VPU multiply + XLU cross-lane reduction.
    logits = jnp.sum(h2 * w3_ref[...], axis=-1, keepdims=True) + b3_ref[...]
    # Sigmoid = 1 / (1 + exp(-z)); exp and reciprocal both run on the EUP.
    # approx reciprocal adds ~1e-3 rel. error — fine for a sigmoid output.
    o_ref[...] = pl.reciprocal(1.0 + jnp.exp(-logits), approx=True).astype(o_ref.dtype)


def _pick_batch_tile(B, dtype):
    """Largest clean power-of-two tile <= 2048 that divides B.

    - cap at 2048 so the working set fits v7x's 64 MiB VMEM (40 MiB budget);
    - cap at B//2 when B >= 512 so the grid has >= 2 parallel steps and the
      second v7x TensorCore isn't idle;
    - respect the sublane tile (8 for f32, 16 for bf16) unless tile == B.
    """
    min_tile = 16 if dtype == jnp.bfloat16 else 8
    cap = min(2048, B)
    if B >= 512:
        cap = min(cap, B // 2)
    for cand in (2048, 1024, 512, 256, 128, 64, 32, 16, 8):
        if min_tile <= cand <= cap and B % cand == 0:
            return cand
    return B


def discriminator_forward(x, params, *, batch_tile=None):
    """x: [B, input_dim] float32 (or bfloat16). Returns [B, 1] float32 sigmoids."""
    B, D = x.shape
    w1, b1 = params["w1"], params["b1"]
    w2, b2 = params["w2"], params["b2"]
    w3, b3 = params["w3"], params["b3"]
    H1 = w1.shape[1]
    H2 = w2.shape[1]
    O = w3.shape[1]
    assert O == 1

    min_tile = 16 if x.dtype == jnp.bfloat16 else 8
    tb = batch_tile if batch_tile is not None else _pick_batch_tile(B, x.dtype)
    assert B % tb == 0, "batch must be divisible by the batch tile"
    assert tb == B or tb % min_tile == 0, "batch tile must match the sublane tile"
    grid = (B // tb,)

    # bf16 MXU weights (tiny, one-off cast); biases + final-layer row stay f32
    # for the VPU epilogue. x is passed through untouched (cast happens
    # in-kernel, hidden under the MXU).
    w1_bf = w1.astype(jnp.bfloat16)
    w2_bf = w2.astype(jnp.bfloat16)
    w3_row = jnp.reshape(w3, (1, H2)).astype(jnp.float32)
    b3_sc = jnp.reshape(b3, (1, 1)).astype(jnp.float32)

    full = lambda i: (0, 0)          # weights/biases shared across batch tiles
    once = pl.Buffered(1)            # constant index_map -> single-buffer them

    flops = 2 * B * (D * H1 + H1 * H2 + H2 * O)
    bytes_accessed = (
        B * D * x.dtype.itemsize       # x (f32 or bf16)
        + (D * H1 + H1 * H2) * 2       # w1, w2 (bf16)
        + (H1 + H2) * 4                # b1, b2 (f32)
        + (H2 + 1) * 4                 # w3 row + b3 (f32)
        + B * O * 4                    # output (f32)
    )

    out = pl.pallas_call(
        _disc_kernel,
        out_shape=jax.ShapeDtypeStruct((B, O), jnp.float32),
        grid_spec=pltpu.PrefetchScalarGridSpec(
            num_scalar_prefetch=0,
            grid=grid,
            in_specs=[
                pl.BlockSpec((tb, D), lambda i: (i, 0)),                # x tile (double-buffered)
                pl.BlockSpec((D, H1), full, pipeline_mode=once),        # w1 (bf16)
                pl.BlockSpec((1, H1), full, pipeline_mode=once),        # b1 (f32)
                pl.BlockSpec((H1, H2), full, pipeline_mode=once),       # w2 (bf16)
                pl.BlockSpec((1, H2), full, pipeline_mode=once),        # b2 (f32)
                pl.BlockSpec((1, H2), full, pipeline_mode=once),        # w3 row (f32)
                pl.BlockSpec((1, 1), full, pipeline_mode=once),         # b3 (f32)
            ],
            out_specs=pl.BlockSpec((tb, O), lambda i: (i, 0)),
        ),
        compiler_params=pltpu.CompilerParams(
            dimension_semantics=("parallel",),
            vmem_limit_bytes=40 * 1024 * 1024,
        ),
        cost_estimate=pl.CostEstimate(
            flops=flops,
            transcendentals=2 * B * O,
            bytes_accessed=bytes_accessed,
        ),
    )(x, w1_bf, b1, w2_bf, b2, w3_row, b3_sc)
    return out


def init_params(key, input_dim=768):
    """Deterministic synthetic init (shapes match the PyTorch module)."""
    k1, k2, k3, k4, k5, k6 = jax.random.split(key, 6)

    def lin(kw, kb, fan_in, fan_out):
        # Kaiming-uniform-ish bound like PyTorch's default nn.Linear init.
        bound = 1.0 / jnp.sqrt(fan_in)
        w = jax.random.uniform(kw, (fan_in, fan_out), jnp.float32, -bound, bound)
        b = jax.random.uniform(kb, (1, fan_out), jnp.float32, -bound, bound)
        return w, b

    w1, b1 = lin(k1, k2, input_dim, 512)
    w2, b2 = lin(k3, k4, 512, 384)
    w3, b3 = lin(k5, k6, 384, 1)
    return {"w1": w1, "b1": b1, "w2": w2, "b2": b2, "w3": w3, "b3": b3}


def _reference_forward(x, p):
    """Pure-JAX reference emulating the kernel math (bf16 ops, f32 accum)."""
    xb = x.astype(jnp.bfloat16)
    w1 = p["w1"].astype(jnp.bfloat16)
    w2 = p["w2"].astype(jnp.bfloat16)
    h1 = jnp.maximum(
        jnp.dot(xb, w1, preferred_element_type=jnp.float32) + p["b1"], 0.0)
    h2 = jnp.maximum(
        jnp.dot(h1.astype(jnp.bfloat16), w2, preferred_element_type=jnp.float32)
        + p["b2"], 0.0)
    logits = h2 @ p["w3"] + p["b3"]
    return jax.nn.sigmoid(logits)


if __name__ == "__main__":
    key = jax.random.PRNGKey(0)
    kx, kx2, kp = jax.random.split(key, 3)

    input_dim = 768  # module default feature width
    params = init_params(kp, input_dim=input_dim)

    # Small batch: single grid step (tb == B == 8).
    x_small = jax.random.normal(kx, (8, input_dim), dtype=jnp.float32)
    out_small = jax.block_until_ready(discriminator_forward(x_small, params))
    ref_small = _reference_forward(x_small, params)
    assert out_small.shape == (8, 1)
    assert jnp.allclose(out_small, ref_small, atol=1e-2, rtol=1e-2), "mismatch (small)"

    # Tiled path: B=512 -> tb=256, grid=(2,): exercises pipelining, the
    # single-buffered weight specs, and the >=2-step megacore split.
    x_big = jax.random.normal(kx2, (512, input_dim), dtype=jnp.float32)
    out_big = jax.block_until_ready(discriminator_forward(x_big, params))
    ref_big = _reference_forward(x_big, params)
    assert out_big.shape == (512, 1)
    assert jnp.allclose(out_big, ref_big, atol=1e-2, rtol=1e-2), "mismatch (tiled)"

    print("KERNEL_OK")
</pallas_src>

<mosaic_0001>
module attributes {stable_mosaic.version = 11 : i64} {
  func.func @_disc_kernel(%arg0: i32, %arg1: memref<8x768xf32, #tpu.memory_space<vmem>>, %arg2: memref<768x512xbf16, #tpu.memory_space<vmem>>, %arg3: memref<1x512xf32, #tpu.memory_space<vmem>>, %arg4: memref<512x384xbf16, #tpu.memory_space<vmem>>, %arg5: memref<1x384xf32, #tpu.memory_space<vmem>>, %arg6: memref<1x384xf32, #tpu.memory_space<vmem>>, %arg7: memref<1x1xf32, #tpu.memory_space<vmem>>, %arg8: memref<8x1xf32, #tpu.memory_space<vmem>>) attributes {dimension_semantics = [#tpu.dimension_semantics<parallel>], iteration_bounds = array<i64: 1>, scalar_prefetch = 0 : i64, scratch_operands = 0 : i64, tpu.core_type = #tpu.core_type<tc>, window_params = [{transform_indices = @transform_0, window_bounds = array<i64: 8, 768>}, {pipeline_mode = #tpu.pipeline_mode<synchronous>, transform_indices = @transform_1, window_bounds = array<i64: 768, 512>}, {pipeline_mode = #tpu.pipeline_mode<synchronous>, transform_indices = @transform_2, window_bounds = array<i64: 1, 512>}, {pipeline_mode = #tpu.pipeline_mode<synchronous>, transform_indices = @transform_3, window_bounds = array<i64: 512, 384>}, {pipeline_mode = #tpu.pipeline_mode<synchronous>, transform_indices = @transform_4, window_bounds = array<i64: 1, 384>}, {pipeline_mode = #tpu.pipeline_mode<synchronous>, transform_indices = @transform_5, window_bounds = array<i64: 1, 384>}, {pipeline_mode = #tpu.pipeline_mode<synchronous>, transform_indices = @transform_6, window_bounds = array<i64: 1, 1>}, {transform_indices = @transform_7, window_bounds = array<i64: 8, 1>}]} {
    %c0 = arith.constant 0 : index
    %c0_0 = arith.constant 0 : index
    %0 = vector.load %arg1[%c0, %c0_0] : memref<8x768xf32, #tpu.memory_space<vmem>>, vector<8x768xf32>
    %1 = arith.truncf %0 : vector<8x768xf32> to vector<8x768xbf16>
    %c0_1 = arith.constant 0 : index
    %c0_2 = arith.constant 0 : index
    %2 = vector.load %arg2[%c0_1, %c0_2] : memref<768x512xbf16, #tpu.memory_space<vmem>>, vector<768x512xbf16>
    %cst = arith.constant dense<0.000000e+00> : vector<8x512xf32>
    %3 = tpu.matmul %1, %2, %cst {dimension_numbers = #tpu.dot_dimension_numbers<[1], [0], [0], [1], [0, 0, 1, 1], [], []>} : vector<8x768xbf16>, vector<768x512xbf16>, vector<8x512xf32> -> vector<8x512xf32>
    %c0_3 = arith.constant 0 : index
    %c0_4 = arith.constant 0 : index
    %4 = vector.load %arg3[%c0_3, %c0_4] : memref<1x512xf32, #tpu.memory_space<vmem>>, vector<1x512xf32>
    %5 = vector.broadcast %4 : vector<1x512xf32> to vector<8x512xf32>
    %6 = arith.addf %3, %5 : vector<8x512xf32>
    %cst_5 = arith.constant 0.000000e+00 : f32
    %7 = vector.broadcast %cst_5 : f32 to vector<8x512xf32>
    %8 = arith.maximumf %6, %7 : vector<8x512xf32>
    %9 = arith.truncf %8 : vector<8x512xf32> to vector<8x512xbf16>
    %c0_6 = arith.constant 0 : index
    %c0_7 = arith.constant 0 : index
    %10 = vector.load %arg4[%c0_6, %c0_7] : memref<512x384xbf16, #tpu.memory_space<vmem>>, vector<512x384xbf16>
    %cst_8 = arith.constant dense<0.000000e+00> : vector<8x384xf32>
    %11 = tpu.matmul %9, %10, %cst_8 {dimension_numbers = #tpu.dot_dimension_numbers<[1], [0], [0], [1], [0, 0, 1, 1], [], []>} : vector<8x512xbf16>, vector<512x384xbf16>, vector<8x384xf32> -> vector<8x384xf32>
    %c0_9 = arith.constant 0 : index
    %c0_10 = arith.constant 0 : index
    %12 = vector.load %arg5[%c0_9, %c0_10] : memref<1x384xf32, #tpu.memory_space<vmem>>, vector<1x384xf32>
    %13 = vector.broadcast %12 : vector<1x384xf32> to vector<8x384xf32>
    %14 = arith.addf %11, %13 : vector<8x384xf32>
    %cst_11 = arith.constant 0.000000e+00 : f32
    %15 = vector.broadcast %cst_11 : f32 to vector<8x384xf32>
    %16 = arith.maximumf %14, %15 : vector<8x384xf32>
    %c0_12 = arith.constant 0 : index
    %c0_13 = arith.constant 0 : index
    %17 = vector.load %arg6[%c0_12, %c0_13] : memref<1x384xf32, #tpu.memory_space<vmem>>, vector<1x384xf32>
    %18 = vector.broadcast %17 : vector<1x384xf32> to vector<8x384xf32>
    %19 = arith.mulf %16, %18 : vector<8x384xf32>
    %cst_14 = arith.constant dense<0.000000e+00> : vector<8xf32>
    %20 = vector.multi_reduction <add>, %19, %cst_14 [1] : vector<8x384xf32> to vector<8xf32>
    %21 = vector.shape_cast %20 : vector<8xf32> to vector<8x1xf32>
    %c0_15 = arith.constant 0 : index
    %c0_16 = arith.constant 0 : index
    %22 = vector.load %arg7[%c0_15, %c0_16] : memref<1x1xf32, #tpu.memory_space<vmem>>, vector<1x1xf32>
    %23 = vector.broadcast %22 : vector<1x1xf32> to vector<8x1xf32>
    %24 = arith.addf %21, %23 : vector<8x1xf32>
    %cst_17 = arith.constant 0.000000e+00 : f32
    %25 = vector.broadcast %cst_17 : f32 to vector<8x1xf32>
    %26 = arith.subf %25, %24 : vector<8x1xf32>
    %27 = math.exp %26 : vector<8x1xf32>
    %cst_18 = arith.constant 1.000000e+00 : f32
    %28 = vector.broadcast %cst_18 : f32 to vector<8x1xf32>
    %29 = arith.addf %28, %27 : vector<8x1xf32>
    %30 = tpu.reciprocal %29 {approx = true} : vector<8x1xf32> -> vector<8x1xf32>
    %c0_19 = arith.constant 0 : index
    %c0_20 = arith.constant 0 : index
    %31 = vector.load %arg8[%c0_19, %c0_20] : memref<8x1xf32, #tpu.memory_space<vmem>>, vector<8x1xf32>
    tpu.vector_store %arg8[%c0_19, %c0_20], %30 {strides = array<i32>} : memref<8x1xf32, #tpu.memory_space<vmem>>, vector<8x1xf32>,
    return
  }
  func.func @transform_0(%arg0: i32) -> (i32, i32) {
    %c0_i32 = arith.constant 0 : i32
    %c0_i32_0 = arith.constant 0 : i32
    return %arg0, %c0_i32 : i32, i32
  }
  func.func @transform_1(%arg0: i32) -> (i32, i32) {
    %c0_i32 = arith.constant 0 : i32
    %c0_i32_0 = arith.constant 0 : i32
    %c0_i32_1 = arith.constant 0 : i32
    return %c0_i32, %c0_i32_0 : i32, i32
  }
  func.func @transform_2(%arg0: i32) -> (i32, i32) {
    %c0_i32 = arith.constant 0 : i32
    %c0_i32_0 = arith.constant 0 : i32
    %c0_i32_1 = arith.constant 0 : i32
    return %c0_i32, %c0_i32_0 : i32, i32
  }
  func.func @transform_3(%arg0: i32) -> (i32, i32) {
    %c0_i32 = arith.constant 0 : i32
    %c0_i32_0 = arith.constant 0 : i32
    %c0_i32_1 = arith.constant 0 : i32
    return %c0_i32, %c0_i32_0 : i32, i32
  }
  func.func @transform_4(%arg0: i32) -> (i32, i32) {
    %c0_i32 = arith.constant 0 : i32
    %c0_i32_0 = arith.constant 0 : i32
    %c0_i32_1 = arith.constant 0 : i32
    return %c0_i32, %c0_i32_0 : i32, i32
  }
  func.func @transform_5(%arg0: i32) -> (i32, i32) {
    %c0_i32 = arith.constant 0 : i32
    %c0_i32_0 = arith.constant 0 : i32
    %c0_i32_1 = arith.constant 0 : i32
    return %c0_i32, %c0_i32_0 : i32, i32
  }
  func.func @transform_6(%arg0: i32) -> (i32, i32) {
    %c0_i32 = arith.constant 0 : i32
    %c0_i32_0 = arith.constant 0 : i32
    %c0_i32_1 = arith.constant 0 : i32
    return %c0_i32, %c0_i32_0 : i32, i32
  }
  func.func @transform_7(%arg0: i32) -> (i32, i32) {
    %c0_i32 = arith.constant 0 : i32
    %c0_i32_0 = arith.constant 0 : i32
    return %arg0, %c0_i32 : i32, i32
  }
}

</mosaic_0001>

<bundles_post_ra>
// kernel: tpu_custom_call.1
= control target key start
LH: loop header
LB: loop body
LE: loop exit
PB: predicated region body
PF: predicated region fallthrough
CT: control target
= control target key end

     0   :  { %s3309_s0 = inlined_call_operand.hbm [shape: f32[8,768], index: 0, kind: input, shape index: {}]   ;;  %s3310_s1 = inlined_call_operand.hbm [shape: bf16[768,512], index: 1, kind: input, shape index: {}]   ;;  %s3311_s2 = inlined_call_operand.vmem [shape: f32[1,512], index: 2, kind: input, shape index: {}]   ;;  %s3312_s3 = inlined_call_operand.hbm [shape: bf16[512,384], index: 3, kind: input, shape index: {}]   ;;  %s3313_s4 = inlined_call_operand.vmem [shape: f32[1,384], index: 4, kind: input, shape index: {}]   ;;  %s3314_s5 = inlined_call_operand.vmem [shape: f32[1,384], index: 5, kind: input, shape index: {}]   ;;  %s3315_s6 = inlined_call_operand.<no memory space> [shape: f32[1,1], index: 6, kind: input, shape index: {}]   ;;  %s3316_s7 = inlined_call_operand.vmem [shape: f32[8,1], index: 7, kind: output, shape index: {}]  }
   0x1   :  { %v12_v0 = vstv %s3315_s6 }
   0x2   :  { %13 = vst [vmem:[#allocation2] sm:$0x1] %v12_v0 }
   0x3   :  { %14 = vsyncpa [#allocation4], 0 }
   0x4   :  { %15 = vsyncpa [#allocation6], 0  ;;  %s3199_s26 = smov [#allocation5]  }
   0x5   :  { %s31_s27 = sshll.u32 %s3199_s26, 4  ;;  %s32_s27 = int_to_ptr.vmem [resolvable:$true] %s31_s27 }
   0x6   :  { %s3143_s28 = scalar_lea.vmem %s32_s27, 24576  ;;  %p3148_p1 = scmp.lt.s32.totalorder %s32_s27, %s32_s27 }
   0x7   :  { %p3144_p0 = scmp.ne.s32.totalorder %s32_s27, %s3143_s28  ;;  %p3149_p2 = scmp.lt.s32.totalorder %s3143_s28, %s3143_s28 }
   0x9   :  { %p3150_p3 = por %p3149_p2, %p3148_p1 }
   0xb   :  { %p3151_p4 = pnand %p3150_p3, %p3144_p0 }
   0xd   :  { %3154 = shalt.err (!%p3151_p4)
}
   0xe   :  { %s3200_s29 = smov 256   ;;  %s3201_s30 = smov 16  }
   0xf   :  { %37 = dma.hbm_to_vmem [thread:$0]  %s3310_s1, 24576, %s32_s27, [#allocation6], %s3200_s29, %s3200_s29, %s3201_s30  }
  0x10   :  { %s3202_s6 = smov [#allocation3]   ;;  %s3203_s11 = smov [#allocation7]  }
  0x11   :  { %s22_s10 = sshll.u32 %s3202_s6, 4  ;;  %s45_s12 = sshll.u32 %s3203_s11, 4  ;;  %s23_s10 = int_to_ptr.vmem [resolvable:$true] %s22_s10  ;;  %s46_s12 = int_to_ptr.vmem [resolvable:$true] %s45_s12 }
  0x12   :  { %s3163_s13 = scalar_lea.vmem %s23_s10, 768  ;;  %p3168_p6 = scmp.lt.s32.totalorder %s23_s10, %s23_s10 }
  0x13   :  { %p3164_p5 = scmp.ne.s32.totalorder %s23_s10, %s3163_s13  ;;  %p3169_p7 = scmp.lt.s32.totalorder %s3163_s13, %s3163_s13 }
  0x15   :  { %p3170_p8 = por %p3169_p7, %p3168_p6 }
  0x17   :  { %p3171_p9 = pnand %p3170_p8, %p3164_p5 }
  0x19   :  { %3174 = shalt.err (!%p3171_p9)
}
  0x1a   :  { %25 = dma.hbm_to_vmem [thread:$0]  %s3309_s0, 768, %s23_s10, [#allocation4]  }
  0x1b   :  { %s3183_s16 = scalar_lea.vmem %s46_s12, 12288  ;;  %p3188_p11 = scmp.lt.s32.totalorder %s46_s12, %s46_s12 }
  0x1c   :  { %p3184_p10 = scmp.ne.s32.totalorder %s46_s12, %s3183_s16  ;;  %p3189_p12 = scmp.lt.s32.totalorder %s3183_s16, %s3183_s16 }
  0x1e   :  { %p3190_p13 = por %p3189_p12, %p3188_p11 }
  0x20   :  { %p3191_p0 = pnand %p3190_p13, %p3184_p10 }
  0x22   :  { %3194 = shalt.err (!%p3191_p0)
}
  0x23   :  { %s3204_s1 = smov 192   ;;  %s3205_s17 = smov 12  }
  0x24   :  { %51 = dma.hbm_to_vmem [thread:$0]  %s3312_s3, 12288, %s46_s12, [#allocation6], %s3204_s1, %s3204_s1, %s3205_s17  }
  0x25   :  { %3195 = dma.done.wait [#allocation4], 768  }
  0x26   :  { %3196 = vsyncadd [#allocation4], 4294966528 }
  0x27   :  { %3197 = dma.done.wait [#allocation6], 36864  }
  0x28   :  { %3198 = vsyncadd [#allocation6], 4294930432  ;;  %v2715_v1 = vld [vmem:[#allocation5 + $0xe4] ss:$16 sps:$4 sm:$0xff]   ;;  %v2719_v3 = vld [vmem:[#allocation5 + $0xe0] ss:$16 sps:$4 sm:$0xff]  }
  0x29   :  { %v2717_v2 = vld [vmem:[#allocation5 + $0x2e4] ss:$16 sps:$4 sm:$0xff]   ;;  %1254 = vmatprep.subr.bf16.mxu0 %v2715_v1  ;;  %v2720_v4 = vld [vmem:[#allocation5 + $0x2e0] ss:$16 sps:$4 sm:$0xff]   ;;  %v69_v47 = vld [vmem:[#allocation3 + $0x8] sm:$0xff]  ;;  %vm2367_vm0 = vcmask 7168  }
  0x2a   :  { %1295 = vmatprep.subr.bf16.mxu1 %v2717_v2  ;;  %v2721_v5 = vld [vmem:[#allocation5 + $0xc4] ss:$16 sps:$4 sm:$0xff]   ;;  %1255 = vmatpush1.bf16.msra.mxu0 %v2719_v3  ;;  %v2725_v7 = vld [vmem:[#allocation5 + $0xc0] ss:$16 sps:$4 sm:$0xff]   ;;  %v3258_v50 = vpack.c.bf16 %v69_v47, %v69_v47  ;;  %v71_v51 = vld [vmem:[#allocation3 + $0x18] sm:$0xff] }
  0x2b   :  { %1296 = vmatpush1.bf16.msra.mxu1 %v2720_v4  ;;  %v2723_v6 = vld [vmem:[#allocation5 + $0x2c4] ss:$16 sps:$4 sm:$0xff]   ;;  %1256 = vmatprep.subr.bf16.mxu0 %v2721_v5  ;;  %v2726_v8 = vld [vmem:[#allocation5 + $0x2c0] ss:$16 sps:$4 sm:$0xff]   ;;  %v3260_v53 = vpack.c.bf16 %v71_v51, %v71_v51 }
  0x2c   :  { %1297 = vmatprep.subr.bf16.mxu1 %v2723_v6  ;;  %v2727_v9 = vld [vmem:[#allocation5 + $0xa4] ss:$16 sps:$4 sm:$0xff]   ;;  %v2731_v11 = vld [vmem:[#allocation5 + $0xa0] ss:$16 sps:$4 sm:$0xff]   ;;  %1286 = vmatprep.mubr.bf16.mxu0 %v3258_v50 }
  0x2d   :  { %v2729_v10 = vld [vmem:[#allocation5 + $0x2a4] ss:$16 sps:$4 sm:$0xff]   ;;  %v2732_v12 = vld [vmem:[#allocation5 + $0x2a0] ss:$16 sps:$4 sm:$0xff]   ;;  %1327 = vmatprep.mubr.bf16.mxu1 %v3260_v53 }
  0x2e   :  { %1257 = vmatpush1.bf16.msra.mxu0 %v2725_v7  ;;  %v2733_v13 = vld [vmem:[#allocation5 + $0x84] ss:$16 sps:$4 sm:$0xff]   ;;  %v2737_v15 = vld [vmem:[#allocation5 + $0x80] ss:$16 sps:$4 sm:$0xff]  }
  0x2f   :  { %1298 = vmatpush1.bf16.msra.mxu1 %v2726_v8  ;;  %1258 = vmatprep.subr.bf16.mxu0 %v2727_v9  ;;  %v2735_v14 = vld [vmem:[#allocation5 + $0x284] ss:$16 sps:$4 sm:$0xff]   ;;  %v2738_v16 = vld [vmem:[#allocation5 + $0x280] ss:$16 sps:$4 sm:$0xff]   ;;  %v2816_v8 = vld [vmem:[#allocation5 + $0xec] ss:$16 sps:$4 sm:$0xff]  }
  0x30   :  { %1299 = vmatprep.subr.bf16.mxu1 %v2729_v10  ;;  %v2739_v17 = vld [vmem:[#allocation5 + $0x64] ss:$16 sps:$4 sm:$0xff]   ;;  %v2743_v19 = vld [vmem:[#allocation5 + $0x60] ss:$16 sps:$4 sm:$0xff]  }
  0x31   :  { %v2741_v18 = vld [vmem:[#allocation5 + $0x264] ss:$16 sps:$4 sm:$0xff]   ;;  %v2744_v20 = vld [vmem:[#allocation5 + $0x260] ss:$16 sps:$4 sm:$0xff]  }
  0x32   :  { %1259 = vmatpush1.bf16.msra.mxu0 %v2731_v11  ;;  %v2745_v21 = vld [vmem:[#allocation5 + $0x44] ss:$16 sps:$4 sm:$0xff]   ;;  %v2749_v23 = vld [vmem:[#allocation5 + $0x40] ss:$16 sps:$4 sm:$0xff]  }
  0x33   :  { %1300 = vmatpush1.bf16.msra.mxu1 %v2732_v12  ;;  %1260 = vmatprep.subr.bf16.mxu0 %v2733_v13  ;;  %v2747_v22 = vld [vmem:[#allocation5 + $0x244] ss:$16 sps:$4 sm:$0xff]   ;;  %v2750_v24 = vld [vmem:[#allocation5 + $0x240] ss:$16 sps:$4 sm:$0xff]   ;;  %v2814_v12 = vld [vmem:[#allocation5 + $0xe8] ss:$16 sps:$4 sm:$0xff]  }
  0x34   :  { %1301 = vmatprep.subr.bf16.mxu1 %v2735_v14  ;;  %v2751_v25 = vld [vmem:[#allocation5 + $0x24] ss:$16 sps:$4 sm:$0xff]   ;;  %v2755_v27 = vld [vmem:[#allocation5 + $0x20] ss:$16 sps:$4 sm:$0xff]   ;;  %v2822_v14 = vld [vmem:[#allocation5 + $0xcc] ss:$16 sps:$4 sm:$0xff]  }
  0x35   :  { %v2753_v26 = vld [vmem:[#allocation5 + $0x224] ss:$16 sps:$4 sm:$0xff]   ;;  %v2756_v28 = vld [vmem:[#allocation5 + $0x220] ss:$16 sps:$4 sm:$0xff]  }
  0x36   :  { %1261 = vmatpush1.bf16.msra.mxu0 %v2737_v15  ;;  %v2757_v29 = vld [vmem:[#allocation5 + $0x4] ss:$16 sps:$4 sm:$0xff]   ;;  %v2761_v31 = vld [vmem:[#allocation5] ss:$16 sps:$4 sm:$0xff]  }
  0x37   :  { %1302 = vmatpush1.bf16.msra.mxu1 %v2738_v16  ;;  %1262 = vmatprep.subr.bf16.mxu0 %v2739_v17  ;;  %v2759_v30 = vld [vmem:[#allocation5 + $0x204] ss:$16 sps:$4 sm:$0xff]   ;;  %v2762_v32 = vld [vmem:[#allocation5 + $0x200] ss:$16 sps:$4 sm:$0xff]   ;;  %v2820_v16 = vld [vmem:[#allocation5 + $0xc8] ss:$16 sps:$4 sm:$0xff]  }
  0x38   :  { %1303 = vmatprep.subr.bf16.mxu1 %v2741_v18  ;;  %v2763_v33 = vld [vmem:[#allocation5 + $0x1e4] ss:$16 sps:$4 sm:$0xff]   ;;  %v2767_v35 = vld [vmem:[#allocation5 + $0x1e0] ss:$16 sps:$4 sm:$0xff]   ;;  %v2828_v18 = vld [vmem:[#allocation5 + $0xac] ss:$16 sps:$4 sm:$0xff]  }
  0x39   :  { %v2765_v34 = vld [vmem:[#allocation5 + $0x3e4] ss:$16 sps:$4 sm:$0xff]   ;;  %v2768_v36 = vld [vmem:[#allocation5 + $0x3e0] ss:$16 sps:$4 sm:$0xff]  }
  0x3a   :  { %1263 = vmatpush1.bf16.msra.mxu0 %v2743_v19  ;;  %v2769_v37 = vld [vmem:[#allocation5 + $0x1c4] ss:$16 sps:$4 sm:$0xff]   ;;  %v2773_v39 = vld [vmem:[#allocation5 + $0x1c0] ss:$16 sps:$4 sm:$0xff]  }
  0x3b   :  { %1304 = vmatpush1.bf16.msra.mxu1 %v2744_v20  ;;  %1264 = vmatprep.subr.bf16.mxu0 %v2745_v21  ;;  %v2771_v38 = vld [vmem:[#allocation5 + $0x3c4] ss:$16 sps:$4 sm:$0xff]   ;;  %v2774_v40 = vld [vmem:[#allocation5 + $0x3c0] ss:$16 sps:$4 sm:$0xff]   ;;  %v2826_v20 = vld [vmem:[#allocation5 + $0xa8] ss:$16 sps:$4 sm:$0xff]  }
  0x3c   :  { %1305 = vmatprep.subr.bf16.mxu1 %v2747_v22  ;;  %v2775_v41 = vld [vmem:[#allocation5 + $0x1a4] ss:$16 sps:$4 sm:$0xff]   ;;  %v2779_v43 = vld [vmem:[#allocation5 + $0x1a0] ss:$16 sps:$4 sm:$0xff]   ;;  %v2834_v22 = vld [vmem:[#allocation5 + $0x8c] ss:$16 sps:$4 sm:$0xff]  }
  0x3d   :  { %v2777_v42 = vld [vmem:[#allocation5 + $0x3a4] ss:$16 sps:$4 sm:$0xff]   ;;  %v2780_v44 = vld [vmem:[#allocation5 + $0x3a0] ss:$16 sps:$4 sm:$0xff]  }
  0x3e   :  { %1265 = vmatpush1.bf16.msra.mxu0 %v2749_v23  ;;  %v2781_v45 = vld [vmem:[#allocation5 + $0x184] ss:$16 sps:$4 sm:$0xff]   ;;  %v2785_v48 = vld [vmem:[#allocation5 + $0x180] ss:$16 sps:$4 sm:$0xff]  }
  0x3f   :  { %1306 = vmatpush1.bf16.msra.mxu1 %v2750_v24  ;;  %1266 = vmatprep.subr.bf16.mxu0 %v2751_v25  ;;  %v2783_v46 = vld [vmem:[#allocation5 + $0x384] ss:$16 sps:$4 sm:$0xff]   ;;  %v2786_v49 = vld [vmem:[#allocation5 + $0x380] ss:$16 sps:$4 sm:$0xff]   ;;  %v2832_v24 = vld [vmem:[#allocation5 + $0x88] ss:$16 sps:$4 sm:$0xff]  }
  0x40   :  { %1307 = vmatprep.subr.bf16.mxu1 %v2753_v26  ;;  %v2787_v52 = vld [vmem:[#allocation5 + $0x164] ss:$16 sps:$4 sm:$0xff]   ;;  %v2791_v55 = vld [vmem:[#allocation5 + $0x160] ss:$16 sps:$4 sm:$0xff]   ;;  %v2840_v26 = vld [vmem:[#allocation5 + $0x6c] ss:$16 sps:$4 sm:$0xff]  }
  0x41   :  { %v2789_v54 = vld [vmem:[#allocation5 + $0x364] ss:$16 sps:$4 sm:$0xff]   ;;  %v2792_v56 = vld [vmem:[#allocation5 + $0x360] ss:$16 sps:$4 sm:$0xff]  }
  0x42   :  { %1267 = vmatpush1.bf16.msra.mxu0 %v2755_v27  ;;  %v2793_v57 = vld [vmem:[#allocation5 + $0x144] ss:$16 sps:$4 sm:$0xff]   ;;  %v2797_v59 = vld [vmem:[#allocation5 + $0x140] ss:$16 sps:$4 sm:$0xff]  }
  0x43   :  { %1308 = vmatpush1.bf16.msra.mxu1 %v2756_v28  ;;  %1268 = vmatprep.subr.bf16.mxu0 %v2757_v29  ;;  %v2795_v58 = vld [vmem:[#allocation5 + $0x344] ss:$16 sps:$4 sm:$0xff]   ;;  %v2798_v60 = vld [vmem:[#allocation5 + $0x340] ss:$16 sps:$4 sm:$0xff]   ;;  %v2838_v28 = vld [vmem:[#allocation5 + $0x68] ss:$16 sps:$4 sm:$0xff]  }
  0x44   :  { %1309 = vmatprep.subr.bf16.mxu1 %v2759_v30  ;;  %v2799_v61 = vld [vmem:[#allocation5 + $0x124] ss:$16 sps:$4 sm:$0xff]   ;;  %v2803_v63 = vld [vmem:[#allocation5 + $0x120] ss:$16 sps:$4 sm:$0xff]   ;;  %v2846_v30 = vld [vmem:[#allocation5 + $0x4c] ss:$16 sps:$4 sm:$0xff]  }
  0x45   :  { %v2801_v62 = vld [vmem:[#allocation5 + $0x324] ss:$16 sps:$4 sm:$0xff]   ;;  %v2804_v0 = vld [vmem:[#allocation5 + $0x320] ss:$16 sps:$4 sm:$0xff]  }
  0x46   :  { %1269 = vmatpush1.bf16.msra.mxu0 %v2761_v31  ;;  %v2805_v1 = vld [vmem:[#allocation5 + $0x104] ss:$16 sps:$4 sm:$0xff]   ;;  %v2809_v3 = vld [vmem:[#allocation5 + $0x100] ss:$16 sps:$4 sm:$0xff]  }
  0x47   :  { %1310 = vmatpush1.bf16.msra.mxu1 %v2762_v32  ;;  %1270 = vmatprep.subr.bf16.mxu0 %v2763_v33  ;;  %v2807_v2 = vld [vmem:[#allocation5 + $0x304] ss:$16 sps:$4 sm:$0xff]   ;;  %v2810_v4 = vld [vmem:[#allocation5 + $0x300] ss:$16 sps:$4 sm:$0xff]   ;;  %v2844_v32 = vld [vmem:[#allocation5 + $0x48] ss:$16 sps:$4 sm:$0xff]  }
  0x48   :  { %1311 = vmatprep.subr.bf16.mxu1 %v2765_v34  ;;  %v68_v5 = vld [vmem:[#allocation3] sm:$0xff]  ;;  %v70_v6 = vld [vmem:[#allocation3 + $0x10] sm:$0xff]  ;;  %v2852_v34 = vld [vmem:[#allocation5 + $0x2c] ss:$16 sps:$4 sm:$0xff]  }
  0x49   :  { %v2813_v7 = vld [vmem:[#allocation5 + $0x4e4] ss:$16 sps:$4 sm:$0xff]   ;;  %v3264_v9 = vpack.c.bf16 %v68_v5, %v68_v5  ;;  %v3266_v10 = vpack.c.bf16 %v70_v6, %v70_v6  ;;  %v2811_v11 = vld [vmem:[#allocation5 + $0x4e0] ss:$16 sps:$4 sm:$0xff]   ;;  %v2900_v5 = vld [vmem:[#allocation5 + $0x12c] ss:$16 sps:$4 sm:$0xff]  }
  0x4a   :  { %1271 = vmatpush2.bf16.msra.mxu0 %v2767_v35  ;;  %v2819_v13 = vld [vmem:[#allocation5 + $0x4c4] ss:$16 sps:$4 sm:$0xff]   ;;  %v2817_v15 = vld [vmem:[#allocation5 + $0x4c0] ss:$16 sps:$4 sm:$0xff]   ;;  %v73_v35 = vld [vmem:[#allocation3 + $0x28] sm:$0xff] }
  0x4b   :  { %1312 = vmatpush2.bf16.msra.mxu1 %v2768_v36  ;;  %1272 = vmatprep.subr.bf16.mxu0 %v2769_v37  ;;  %v2825_v17 = vld [vmem:[#allocation5 + $0x4a4] ss:$16 sps:$4 sm:$0xff]   ;;  %v2823_v19 = vld [vmem:[#allocation5 + $0x4a0] ss:$16 sps:$4 sm:$0xff]   ;;  %v3271_v36 = vpack.c.bf16 %v73_v35, %v73_v35  ;;  %v2942_v35 = vld [vmem:[#allocation5 + $0x44c] ss:$16 sps:$4 sm:$0xff]  }
  0x4c   :  { %1313 = vmatprep.subr.bf16.mxu1 %v2771_v38  ;;  %v2831_v21 = vld [vmem:[#allocation5 + $0x484] ss:$16 sps:$4 sm:$0xff]   ;;  %v2829_v23 = vld [vmem:[#allocation5 + $0x480] ss:$16 sps:$4 sm:$0xff]   ;;  %v2850_v38 = vld [vmem:[#allocation5 + $0x28] ss:$16 sps:$4 sm:$0xff]  }
  0x4d   :  { %v2837_v25 = vld [vmem:[#allocation5 + $0x464] ss:$16 sps:$4 sm:$0xff]   ;;  %v2835_v27 = vld [vmem:[#allocation5 + $0x460] ss:$16 sps:$4 sm:$0xff]  }
  0x4e   :  { %1273 = vmatpush2.bf16.msra.mxu0 %v2773_v39  ;;  %v2843_v29 = vld [vmem:[#allocation5 + $0x444] ss:$16 sps:$4 sm:$0xff]   ;;  %v2841_v31 = vld [vmem:[#allocation5 + $0x440] ss:$16 sps:$4 sm:$0xff]  }
  0x4f   :  { %1314 = vmatpush2.bf16.msra.mxu1 %v2774_v40  ;;  %1274 = vmatprep.subr.bf16.mxu0 %v2775_v41  ;;  %v2849_v33 = vld [vmem:[#allocation5 + $0x424] ss:$16 sps:$4 sm:$0xff]   ;;  %v2847_v37 = vld [vmem:[#allocation5 + $0x420] ss:$16 sps:$4 sm:$0xff]   ;;  %v2858_v40 = vld [vmem:[#allocation5 + $0xc] ss:$16 sps:$4 sm:$0xff]  }
  0x50   :  { %1315 = vmatprep.subr.bf16.mxu1 %v2777_v42  ;;  %v2855_v39 = vld [vmem:[#allocation5 + $0x404] ss:$16 sps:$4 sm:$0xff]   ;;  %v2853_v41 = vld [vmem:[#allocation5 + $0x400] ss:$16 sps:$4 sm:$0xff]   ;;  %v2856_v42 = vld [vmem:[#allocation5 + $0x8] ss:$16 sps:$4 sm:$0xff]  }
  0x51   :  { %v2867_v47 = vld [vmem:[#allocation5 + $0x5c4] ss:$16 sps:$4 sm:$0xff]   ;;  %v2895_v6 = vld [vmem:[#allocation5 + $0x520] ss:$16 sps:$4 sm:$0xff]  }
  0x52   :  { %1275 = vmatpush2.bf16.msra.mxu0 %v2779_v43  ;;  %v2861_v43 = vld [vmem:[#allocation5 + $0x5e4] ss:$16 sps:$4 sm:$0xff]  }
  0x53   :  { %1316 = vmatpush2.bf16.msra.mxu1 %v2780_v44  ;;  %1276 = vmatprep.subr.bf16.mxu0 %v2781_v45  ;;  %v2864_v44 = vld [vmem:[#allocation5 + $0x1ec] ss:$16 sps:$4 sm:$0xff]   ;;  %v2859_v45 = vld [vmem:[#allocation5 + $0x5e0] ss:$16 sps:$4 sm:$0xff]   ;;  %v2873_v51 = vld [vmem:[#allocation5 + $0x5a4] ss:$16 sps:$4 sm:$0xff]  }
  0x54   :  { %1317 = vmatprep.subr.bf16.mxu1 %v2783_v46  ;;  %v2862_v46 = vld [vmem:[#allocation5 + $0x1e8] ss:$16 sps:$4 sm:$0xff]  }
  0x56   :  { %1277 = vmatpush2.bf16.msra.mxu0 %v2785_v48  ;;  %v2870_v48 = vld [vmem:[#allocation5 + $0x1cc] ss:$16 sps:$4 sm:$0xff]  }
  0x57   :  { %1318 = vmatpush2.bf16.msra.mxu1 %v2786_v49  ;;  %1278 = vmatprep.subr.bf16.mxu0 %v2787_v52  ;;  %v2865_v49 = vld [vmem:[#allocation5 + $0x5c0] ss:$16 sps:$4 sm:$0xff]   ;;  %v2876_v52 = vld [vmem:[#allocation5 + $0x1ac] ss:$16 sps:$4 sm:$0xff]  }
  0x58   :  { %1319 = vmatprep.subr.bf16.mxu1 %v2789_v54  ;;  %v2871_v54 = vld [vmem:[#allocation5 + $0x5a0] ss:$16 sps:$4 sm:$0xff]  }
  0x5a   :  { %1279 = vmatpush2.bf16.msra.mxu0 %v2791_v55  ;;  %v2874_v55 = vld [vmem:[#allocation5 + $0x1a8] ss:$16 sps:$4 sm:$0xff]  }
  0x5b   :  { %1320 = vmatpush2.bf16.msra.mxu1 %v2792_v56  ;;  %1280 = vmatprep.subr.bf16.mxu0 %v2793_v57  ;;  %v2879_v56 = vld [vmem:[#allocation5 + $0x584] ss:$16 sps:$4 sm:$0xff]   ;;  %v2882_v57 = vld [vmem:[#allocation5 + $0x18c] ss:$16 sps:$4 sm:$0xff]  }
  0x5c   :  { %1321 = vmatprep.subr.bf16.mxu1 %v2795_v58  ;;  %v2877_v58 = vld [vmem:[#allocation5 + $0x580] ss:$16 sps:$4 sm:$0xff]  }
  0x5e   :  { %1281 = vmatpush2.bf16.msra.mxu0 %v2797_v59  ;;  %v2880_v59 = vld [vmem:[#allocation5 + $0x188] ss:$16 sps:$4 sm:$0xff]  }
  0x5f   :  { %1322 = vmatpush2.bf16.msra.mxu1 %v2798_v60  ;;  %1282 = vmatprep.subr.bf16.mxu0 %v2799_v61  ;;  %v2885_v60 = vld [vmem:[#allocation5 + $0x564] ss:$16 sps:$4 sm:$0xff]   ;;  %v2888_v61 = vld [vmem:[#allocation5 + $0x16c] ss:$16 sps:$4 sm:$0xff]  }
  0x60   :  { %1323 = vmatprep.subr.bf16.mxu1 %v2801_v62  ;;  %v2883_v62 = vld [vmem:[#allocation5 + $0x560] ss:$16 sps:$4 sm:$0xff]  }
  0x62   :  { %1283 = vmatpush2.bf16.msra.mxu0 %v2803_v63  ;;  %v2886_v63 = vld [vmem:[#allocation5 + $0x168] ss:$16 sps:$4 sm:$0xff]  }
  0x63   :  { %1324 = vmatpush2.bf16.msra.mxu1 %v2804_v0  ;;  %1284 = vmatprep.subr.bf16.mxu0 %v2805_v1  ;;  %v2891_v0 = vld [vmem:[#allocation5 + $0x544] ss:$16 sps:$4 sm:$0xff]   ;;  %v2894_v1 = vld [vmem:[#allocation5 + $0x14c] ss:$16 sps:$4 sm:$0xff]  }
  0x64   :  { %1325 = vmatprep.subr.bf16.mxu1 %v2807_v2  ;;  %v2889_v2 = vld [vmem:[#allocation5 + $0x540] ss:$16 sps:$4 sm:$0xff]  }
  0x66   :  { %1285 = vmatpush2.bf16.msra.mxu0 %v2809_v3  ;;  %v2892_v3 = vld [vmem:[#allocation5 + $0x148] ss:$16 sps:$4 sm:$0xff]  }
  0x67   :  { %1326 = vmatpush2.bf16.msra.mxu1 %v2810_v4  ;;  %1336 = vmatprep.subr.bf16.mxu0 %v2813_v7  ;;  %v2897_v4 = vld [vmem:[#allocation5 + $0x524] ss:$16 sps:$4 sm:$0xff]   ;;  %v2898_v7 = vld [vmem:[#allocation5 + $0x128] ss:$16 sps:$4 sm:$0xff]  }
  0x68   :  { %1377 = vmatprep.subr.bf16.mxu1 %v2816_v8  ;;  %v2903_v8 = vld [vmem:[#allocation5 + $0x504] ss:$16 sps:$4 sm:$0xff]  }
  0x69   :  { %1287 = vmatmul.mubr.bf16.vlgmr.msra.gmra.mxu0 %v3264_v9 }
  0x6a   :  { %1328 = vmatmul.mubr.bf16.vlgmr.msra.gmra.mxu1 %v3266_v10  ;;  %1337 = vmatpush1.bf16.msra.mxu0 %v2811_v11  ;;  %v2906_v11 = vld [vmem:[#allocation5 + $0x10c] ss:$16 sps:$4 sm:$0xff]  }
  0x6b   :  { %1378 = vmatpush1.bf16.msra.mxu1 %v2814_v12  ;;  %1338 = vmatprep.subr.bf16.mxu0 %v2819_v13  ;;  %v2901_v12 = vld [vmem:[#allocation5 + $0x500] ss:$16 sps:$4 sm:$0xff]   ;;  %v2904_v13 = vld [vmem:[#allocation5 + $0x108] ss:$16 sps:$4 sm:$0xff]  }
  0x6c   :  { %1379 = vmatprep.subr.bf16.mxu1 %v2822_v14  ;;  %1409 = vmatprep.mubr.bf16.mxu1 %v3258_v50  ;;  %v2868_v50 = vld [vmem:[#allocation5 + $0x1c8] ss:$16 sps:$4 sm:$0xff]   ;;  %v72_v14 = vld [vmem:[#allocation3 + $0x20] sm:$0xff] }
  0x6d   :  { %1368 = vmatprep.mubr.bf16.mxu0 %v3271_v36 }
  0x6e   :  { %1339 = vmatpush1.bf16.msra.mxu0 %v2817_v15  ;;  %v2909_v15 = vld [vmem:[#allocation5 + $0x2ec] ss:$16 sps:$4 sm:$0xff]  }
  0x6f   :  { %1380 = vmatpush1.bf16.msra.mxu1 %v2820_v16  ;;  %1340 = vmatprep.subr.bf16.mxu0 %v2825_v17  ;;  %v2912_v16 = vld [vmem:[#allocation5 + $0x4ec] ss:$16 sps:$4 sm:$0xff]   ;;  %v3274_v17 = vpack.c.bf16 %v72_v14, %v72_v14 }
  0x70   :  { %1381 = vmatprep.subr.bf16.mxu1 %v2828_v18  ;;  %v2907_v18 = vld [vmem:[#allocation5 + $0x2e8] ss:$16 sps:$4 sm:$0xff]   ;;  %v3002_v14 = vld [vmem:[#allocation5 + $0x50c] ss:$16 sps:$4 sm:$0xff]  }
  0x72   :  { %1341 = vmatpush1.bf16.msra.mxu0 %v2823_v19  ;;  %v2910_v19 = vld [vmem:[#allocation5 + $0x4e8] ss:$16 sps:$4 sm:$0xff]  }
  0x73   :  { %1382 = vmatpush1.bf16.msra.mxu1 %v2826_v20  ;;  %1342 = vmatprep.subr.bf16.mxu0 %v2831_v21  ;;  %v2915_v20 = vld [vmem:[#allocation5 + $0x2cc] ss:$16 sps:$4 sm:$0xff]  }
  0x74   :  { %1383 = vmatprep.subr.bf16.mxu1 %v2834_v22  ;;  %v2918_v21 = vld [vmem:[#allocation5 + $0x4cc] ss:$16 sps:$4 sm:$0xff]   ;;  %v2913_v22 = vld [vmem:[#allocation5 + $0x2c8] ss:$16 sps:$4 sm:$0xff]  }
  0x76   :  { %1343 = vmatpush1.bf16.msra.mxu0 %v2829_v23  ;;  %v2916_v23 = vld [vmem:[#allocation5 + $0x4c8] ss:$16 sps:$4 sm:$0xff]  }
  0x77   :  { %1384 = vmatpush1.bf16.msra.mxu1 %v2832_v24  ;;  %1344 = vmatprep.subr.bf16.mxu0 %v2837_v25  ;;  %v2921_v24 = vld [vmem:[#allocation5 + $0x2ac] ss:$16 sps:$4 sm:$0xff]  }
  0x78   :  { %1385 = vmatprep.subr.bf16.mxu1 %v2840_v26  ;;  %v2924_v25 = vld [vmem:[#allocation5 + $0x4ac] ss:$16 sps:$4 sm:$0xff]   ;;  %v2919_v26 = vld [vmem:[#allocation5 + $0x2a8] ss:$16 sps:$4 sm:$0xff]  }
  0x7a   :  { %1345 = vmatpush1.bf16.msra.mxu0 %v2835_v27  ;;  %v2922_v27 = vld [vmem:[#allocation5 + $0x4a8] ss:$16 sps:$4 sm:$0xff]  }
  0x7b   :  { %1386 = vmatpush1.bf16.msra.mxu1 %v2838_v28  ;;  %1346 = vmatprep.subr.bf16.mxu0 %v2843_v29  ;;  %v2927_v28 = vld [vmem:[#allocation5 + $0x28c] ss:$16 sps:$4 sm:$0xff]  }
  0x7c   :  { %1387 = vmatprep.subr.bf16.mxu1 %v2846_v30  ;;  %v2930_v29 = vld [vmem:[#allocation5 + $0x48c] ss:$16 sps:$4 sm:$0xff]   ;;  %v2928_v30 = vld [vmem:[#allocation5 + $0x488] ss:$16 sps:$4 sm:$0xff]  }
  0x7e   :  { %1347 = vmatpush1.bf16.msra.mxu0 %v2841_v31  ;;  %v2933_v31 = vld [vmem:[#allocation5 + $0x26c] ss:$16 sps:$4 sm:$0xff]  }
  0x7f   :  { %1388 = vmatpush1.bf16.msra.mxu1 %v2844_v32  ;;  %1348 = vmatprep.subr.bf16.mxu0 %v2849_v33  ;;  %v2936_v32 = vld [vmem:[#allocation5 + $0x46c] ss:$16 sps:$4 sm:$0xff]   ;;  %v2931_v33 = vld [vmem:[#allocation5 + $0x268] ss:$16 sps:$4 sm:$0xff]  }
  0x80   :  { %1389 = vmatprep.subr.bf16.mxu1 %v2852_v34  ;;  %v2939_v34 = vld [vmem:[#allocation5 + $0x24c] ss:$16 sps:$4 sm:$0xff]  }
  0x82   :  { %1349 = vmatpush1.bf16.msra.mxu0 %v2847_v37  ;;  %v2940_v37 = vld [vmem:[#allocation5 + $0x448] ss:$16 sps:$4 sm:$0xff]  }
  0x83   :  { %1390 = vmatpush1.bf16.msra.mxu1 %v2850_v38  ;;  %1350 = vmatprep.subr.bf16.mxu0 %v2855_v39  ;;  %v2945_v38 = vld [vmem:[#allocation5 + $0x22c] ss:$16 sps:$4 sm:$0xff]  }
  0x84   :  { %1391 = vmatprep.subr.bf16.mxu1 %v2858_v40  ;;  %v2948_v39 = vld [vmem:[#allocation5 + $0x42c] ss:$16 sps:$4 sm:$0xff]   ;;  %v2943_v40 = vld [vmem:[#allocation5 + $0x228] ss:$16 sps:$4 sm:$0xff]  }
  0x86   :  { %1351 = vmatpush1.bf16.msra.mxu0 %v2853_v41  ;;  %v2946_v41 = vld [vmem:[#allocation5 + $0x428] ss:$16 sps:$4 sm:$0xff]  }
  0x87   :  { %1392 = vmatpush1.bf16.msra.mxu1 %v2856_v42  ;;  %1352 = vmatprep.subr.bf16.mxu0 %v2861_v43  ;;  %v2951_v42 = vld [vmem:[#allocation5 + $0x20c] ss:$16 sps:$4 sm:$0xff]  }
  0x88   :  { %1393 = vmatprep.subr.bf16.mxu1 %v2864_v44  ;;  %v2954_v43 = vld [vmem:[#allocation5 + $0x40c] ss:$16 sps:$4 sm:$0xff]   ;;  %v2949_v44 = vld [vmem:[#allocation5 + $0x208] ss:$16 sps:$4 sm:$0xff]  }
  0x8a   :  { %1353 = vmatpush2.bf16.msra.mxu0 %v2859_v45  ;;  %v2952_v45 = vld [vmem:[#allocation5 + $0x408] ss:$16 sps:$4 sm:$0xff]  }
  0x8b   :  { %1394 = vmatpush2.bf16.msra.mxu1 %v2862_v46  ;;  %1354 = vmatprep.subr.bf16.mxu0 %v2867_v47  ;;  %v2957_v46 = vld [vmem:[#allocation5 + $0x3ec] ss:$16 sps:$4 sm:$0xff]  }
  0x8c   :  { %1395 = vmatprep.subr.bf16.mxu1 %v2870_v48  ;;  %v2960_v47 = vld [vmem:[#allocation5 + $0x5ec] ss:$16 sps:$4 sm:$0xff]   ;;  %v2955_v48 = vld [vmem:[#allocation5 + $0x3e8] ss:$16 sps:$4 sm:$0xff]  }
  0x8e   :  { %1355 = vmatpush2.bf16.msra.mxu0 %v2865_v49  ;;  %v2958_v49 = vld [vmem:[#allocation5 + $0x5e8] ss:$16 sps:$4 sm:$0xff]  }
  0x8f   :  { %1396 = vmatpush2.bf16.msra.mxu1 %v2868_v50  ;;  %1356 = vmatprep.subr.bf16.mxu0 %v2873_v51  ;;  %v2963_v50 = vld [vmem:[#allocation5 + $0x3cc] ss:$16 sps:$4 sm:$0xff]  }
  0x90   :  { %1397 = vmatprep.subr.bf16.mxu1 %v2876_v52  ;;  %v2966_v51 = vld [vmem:[#allocation5 + $0x5cc] ss:$16 sps:$4 sm:$0xff]   ;;  %v2961_v52 = vld [vmem:[#allocation5 + $0x3c8] ss:$16 sps:$4 sm:$0xff]  }
  0x92   :  { %1357 = vmatpush2.bf16.msra.mxu0 %v2871_v54  ;;  %v2964_v54 = vld [vmem:[#allocation5 + $0x5c8] ss:$16 sps:$4 sm:$0xff]  }
  0x93   :  { %1398 = vmatpush2.bf16.msra.mxu1 %v2874_v55  ;;  %1358 = vmatprep.subr.bf16.mxu0 %v2879_v56  ;;  %v2969_v55 = vld [vmem:[#allocation5 + $0x3ac] ss:$16 sps:$4 sm:$0xff]  }
  0x94   :  { %1399 = vmatprep.subr.bf16.mxu1 %v2882_v57  ;;  %v2972_v56 = vld [vmem:[#allocation5 + $0x5ac] ss:$16 sps:$4 sm:$0xff]   ;;  %v2967_v57 = vld [vmem:[#allocation5 + $0x3a8] ss:$16 sps:$4 sm:$0xff]  }
  0x96   :  { %1359 = vmatpush2.bf16.msra.mxu0 %v2877_v58  ;;  %v2970_v58 = vld [vmem:[#allocation5 + $0x5a8] ss:$16 sps:$4 sm:$0xff]  }
  0x97   :  { %1400 = vmatpush2.bf16.msra.mxu1 %v2880_v59  ;;  %1360 = vmatprep.subr.bf16.mxu0 %v2885_v60  ;;  %v2975_v59 = vld [vmem:[#allocation5 + $0x38c] ss:$16 sps:$4 sm:$0xff]  }
  0x98   :  { %1401 = vmatprep.subr.bf16.mxu1 %v2888_v61  ;;  %v2978_v60 = vld [vmem:[#allocation5 + $0x58c] ss:$16 sps:$4 sm:$0xff]   ;;  %v2973_v61 = vld [vmem:[#allocation5 + $0x388] ss:$16 sps:$4 sm:$0xff]  }
  0x9a   :  { %1361 = vmatpush2.bf16.msra.mxu0 %v2883_v62  ;;  %v2976_v62 = vld [vmem:[#allocation5 + $0x588] ss:$16 sps:$4 sm:$0xff]  }
  0x9b   :  { %1402 = vmatpush2.bf16.msra.mxu1 %v2886_v63  ;;  %1362 = vmatprep.subr.bf16.mxu0 %v2891_v0  ;;  %v2981_v63 = vld [vmem:[#allocation5 + $0x36c] ss:$16 sps:$4 sm:$0xff]  }
  0x9c   :  { %1403 = vmatprep.subr.bf16.mxu1 %v2894_v1  ;;  %v2984_v0 = vld [vmem:[#allocation5 + $0x56c] ss:$16 sps:$4 sm:$0xff]   ;;  %v2979_v1 = vld [vmem:[#allocation5 + $0x368] ss:$16 sps:$4 sm:$0xff]  }
  0x9e   :  { %1363 = vmatpush2.bf16.msra.mxu0 %v2889_v2  ;;  %v2982_v2 = vld [vmem:[#allocation5 + $0x568] ss:$16 sps:$4 sm:$0xff]  }
  0x9f   :  { %1404 = vmatpush2.bf16.msra.mxu1 %v2892_v3  ;;  %1364 = vmatprep.subr.bf16.mxu0 %v2897_v4  ;;  %v2987_v3 = vld [vmem:[#allocation5 + $0x34c] ss:$16 sps:$4 sm:$0xff]  }
  0xa0   :  { %1405 = vmatprep.subr.bf16.mxu1 %v2900_v5  ;;  %v2990_v4 = vld [vmem:[#allocation5 + $0x54c] ss:$16 sps:$4 sm:$0xff]   ;;  %v2985_v5 = vld [vmem:[#allocation5 + $0x348] ss:$16 sps:$4 sm:$0xff]  }
  0xa2   :  { %1365 = vmatpush2.bf16.msra.mxu0 %v2895_v6  ;;  %v2988_v6 = vld [vmem:[#allocation5 + $0x548] ss:$16 sps:$4 sm:$0xff]  }
  0xa3   :  { %1406 = vmatpush2.bf16.msra.mxu1 %v2898_v7  ;;  %1366 = vmatprep.subr.bf16.mxu0 %v2903_v8  ;;  %v2993_v7 = vld [vmem:[#allocation5 + $0x32c] ss:$16 sps:$4 sm:$0xff]  }
  0xa4   :  { %1407 = vmatprep.subr.bf16.mxu1 %v2906_v11  ;;  %v2996_v8 = vld [vmem:[#allocation5 + $0x52c] ss:$16 sps:$4 sm:$0xff]   ;;  %v2991_v11 = vld [vmem:[#allocation5 + $0x328] ss:$16 sps:$4 sm:$0xff]  }
  0xa6   :  { %1367 = vmatpush2.bf16.msra.mxu0 %v2901_v12  ;;  %v2994_v12 = vld [vmem:[#allocation5 + $0x528] ss:$16 sps:$4 sm:$0xff]  }
  0xa7   :  { %1408 = vmatpush2.bf16.msra.mxu1 %v2904_v13  ;;  %1418 = vmatprep.subr.bf16.mxu0 %v2909_v15  ;;  %v2999_v13 = vld [vmem:[#allocation5 + $0x30c] ss:$16 sps:$4 sm:$0xff]   ;;  %v2997_v15 = vld [vmem:[#allocation5 + $0x308] ss:$16 sps:$4 sm:$0xff]  }
  0xa8   :  { %1459 = vmatprep.subr.bf16.mxu1 %v2912_v16  ;;  %v3000_v16 = vld [vmem:[#allocation5 + $0x508] ss:$16 sps:$4 sm:$0xff]  }
  0xa9   :  { %1369 = vmatmul.mubr.bf16.vlgmr.msra.gmra.mxu0 %v3274_v17 }
  0xaa   :  { %1410 = vmatmul.mubr.bf16.vlgmr.msra.gmra.mxu1 %v3264_v9  ;;  %1419 = vmatpush1.bf16.msra.mxu0 %v2907_v18  ;;  %v2925_v9 = vld [vmem:[#allocation5 + $0x288] ss:$16 sps:$4 sm:$0xff]  }
  0xab   :  { %1460 = vmatpush1.bf16.msra.mxu1 %v2910_v19  ;;  %1420 = vmatprep.subr.bf16.mxu0 %v2915_v20  ;;  %v3005_v18 = vld [vmem:[#allocation7 + $0xac] ss:$12 sps:$4 sm:$0xff]   ;;  %v3003_v19 = vld [vmem:[#allocation7 + $0xa8] ss:$12 sps:$4 sm:$0xff]  }
  0xac   :  { %1461 = vmatprep.subr.bf16.mxu1 %v2918_v21  ;;  %1450 = vmatprep.mubr.bf16.mxu0 %v3260_v53  ;;  %v2934_v53 = vld [vmem:[#allocation5 + $0x468] ss:$16 sps:$4 sm:$0xff]   ;;  %v3008_v20 = vld [vmem:[#allocation7 + $0x94] ss:$12 sps:$4 sm:$0xff]   ;;  %v3006_v21 = vld [vmem:[#allocation7 + $0x90] ss:$12 sps:$4 sm:$0xff]  }
  0xad   :  { %1491 = vmatprep.mubr.bf16.mxu1 %v3271_v36  ;;  %v2937_v36 = vld [vmem:[#allocation5 + $0x248] ss:$16 sps:$4 sm:$0xff]  }
  0xae   :  { %1421 = vmatpush1.bf16.msra.mxu0 %v2913_v22  ;;  %v3011_v22 = vld [vmem:[#allocation7 + $0x7c] ss:$12 sps:$4 sm:$0xff]  }
  0xaf   :  { %1462 = vmatpush1.bf16.msra.mxu1 %v2916_v23  ;;  %1422 = vmatprep.subr.bf16.mxu0 %v2921_v24  ;;  %v3009_v23 = vld [vmem:[#allocation7 + $0x78] ss:$12 sps:$4 sm:$0xff]  }
  0xb0   :  { %1463 = vmatprep.subr.bf16.mxu1 %v2924_v25  ;;  %v3014_v24 = vld [vmem:[#allocation7 + $0x64] ss:$12 sps:$4 sm:$0xff]   ;;  %v3012_v25 = vld [vmem:[#allocation7 + $0x60] ss:$12 sps:$4 sm:$0xff]  }
  0xb2   :  { %1423 = vmatpush1.bf16.msra.mxu0 %v2919_v26  ;;  %v3017_v26 = vld [vmem:[#allocation7 + $0x4c] ss:$12 sps:$4 sm:$0xff]  }
  0xb3   :  { %1464 = vmatpush1.bf16.msra.mxu1 %v2922_v27  ;;  %1424 = vmatprep.subr.bf16.mxu0 %v2927_v28  ;;  %v3055_v27 = vld [vmem:[#allocation7 + $0x22c] ss:$12 sps:$4 sm:$0xff]   ;;  %v3053_v28 = vld [vmem:[#allocation7 + $0x228] ss:$12 sps:$4 sm:$0xff]  }
  0xb4   :  { %1465 = vmatprep.subr.bf16.mxu1 %v2930_v29  ;;  %v3015_v29 = vld [vmem:[#allocation7 + $0x48] ss:$12 sps:$4 sm:$0xff]  }
  0xb6   :  { %1425 = vmatpush1.bf16.msra.mxu0 %v2925_v9  ;;  %v3058_v9 = vld [vmem:[#allocation7 + $0x210] ss:$12 sps:$4 sm:$0xff]  }
  0xb7   :  { %1466 = vmatpush1.bf16.msra.mxu1 %v2928_v30  ;;  %1426 = vmatprep.subr.bf16.mxu0 %v2933_v31  ;;  %v3018_v30 = vld [vmem:[#allocation7 + $0x30] ss:$12 sps:$4 sm:$0xff]  }
  0xb8   :  { %1467 = vmatprep.subr.bf16.mxu1 %v2936_v32  ;;  %v3023_v31 = vld [vmem:[#allocation7 + $0x1c] ss:$12 sps:$4 sm:$0xff]  }
  0xb9   :  { %v3065_v32 = vld [vmem:[#allocation7 + $0x1fc] ss:$12 sps:$4 sm:$0xff]  }
  0xba   :  { %1427 = vmatpush1.bf16.msra.mxu0 %v2931_v33  ;;  %v3063_v33 = vld [vmem:[#allocation7 + $0x1f8] ss:$12 sps:$4 sm:$0xff]  }
  0xbb   :  { %1468 = vmatpush1.bf16.msra.mxu1 %v2934_v53  ;;  %1428 = vmatprep.subr.bf16.mxu0 %v2939_v34  ;;  %v3021_v53 = vld [vmem:[#allocation7 + $0x18] ss:$12 sps:$4 sm:$0xff]  }
  0xbc   :  { %1469 = vmatprep.subr.bf16.mxu1 %v2942_v35  ;;  %v3026_v34 = vld [vmem:[#allocation7 + $0x4] ss:$12 sps:$4 sm:$0xff]  }
  0xbd   :  { %v3070_v35 = vld [vmem:[#allocation7 + $0x1e4] ss:$12 sps:$4 sm:$0xff]  }
  0xbe   :  { %1429 = vmatpush1.bf16.msra.mxu0 %v2937_v36  ;;  %v3068_v36 = vld [vmem:[#allocation7 + $0x1e0] ss:$12 sps:$4 sm:$0xff]  }
  0xbf   :  { %1470 = vmatpush1.bf16.msra.mxu1 %v2940_v37  ;;  %1430 = vmatprep.subr.bf16.mxu0 %v2945_v38  ;;  %v3024_v37 = vld [vmem:[#allocation7] ss:$12 sps:$4 sm:$0xff]  }
  0xc0   :  { %1471 = vmatprep.subr.bf16.mxu1 %v2948_v39  ;;  %v3029_v38 = vld [vmem:[#allocation7 + $0x16c] ss:$12 sps:$4 sm:$0xff]  }
  0xc1   :  { %v3075_v39 = vld [vmem:[#allocation7 + $0x1cc] ss:$12 sps:$4 sm:$0xff]  }
  0xc2   :  { %1431 = vmatpush1.bf16.msra.mxu0 %v2943_v40  ;;  %v3073_v40 = vld [vmem:[#allocation7 + $0x1c8] ss:$12 sps:$4 sm:$0xff]  }
  0xc3   :  { %1472 = vmatpush1.bf16.msra.mxu1 %v2946_v41  ;;  %1432 = vmatprep.subr.bf16.mxu0 %v2951_v42  ;;  %v3027_v41 = vld [vmem:[#allocation7 + $0x168] ss:$12 sps:$4 sm:$0xff]  }
  0xc4   :  { %1473 = vmatprep.subr.bf16.mxu1 %v2954_v43  ;;  %v3032_v42 = vld [vmem:[#allocation7 + $0x154] ss:$12 sps:$4 sm:$0xff]  }
  0xc5   :  { %v3080_v43 = vld [vmem:[#allocation7 + $0x1b4] ss:$12 sps:$4 sm:$0xff]  }
  0xc6   :  { %1433 = vmatpush1.bf16.msra.mxu0 %v2949_v44  ;;  %v3078_v44 = vld [vmem:[#allocation7 + $0x1b0] ss:$12 sps:$4 sm:$0xff]  }
  0xc7   :  { %1474 = vmatpush1.bf16.msra.mxu1 %v2952_v45  ;;  %1434 = vmatprep.subr.bf16.mxu0 %v2957_v46  ;;  %v3030_v45 = vld [vmem:[#allocation7 + $0x150] ss:$12 sps:$4 sm:$0xff]  }
  0xc8   :  { %1475 = vmatprep.subr.bf16.mxu1 %v2960_v47  ;;  %v3035_v46 = vld [vmem:[#allocation7 + $0x13c] ss:$12 sps:$4 sm:$0xff]  }
  0xc9   :  { %v3085_v47 = vld [vmem:[#allocation7 + $0x19c] ss:$12 sps:$4 sm:$0xff]  }
  0xca   :  { %1435 = vmatpush2.bf16.msra.mxu0 %v2955_v48  ;;  %v3083_v48 = vld [vmem:[#allocation7 + $0x198] ss:$12 sps:$4 sm:$0xff]  }
  0xcb   :  { %1476 = vmatpush2.bf16.msra.mxu1 %v2958_v49  ;;  %1436 = vmatprep.subr.bf16.mxu0 %v2963_v50  ;;  %v3033_v49 = vld [vmem:[#allocation7 + $0x138] ss:$12 sps:$4 sm:$0xff]  }
  0xcc   :  { %1477 = vmatprep.subr.bf16.mxu1 %v2966_v51  ;;  %v3038_v50 = vld [vmem:[#allocation7 + $0x124] ss:$12 sps:$4 sm:$0xff]  }
  0xcd   :  { %v3090_v51 = vld [vmem:[#allocation7 + $0x184] ss:$12 sps:$4 sm:$0xff]  }
  0xce   :  { %1437 = vmatpush2.bf16.msra.mxu0 %v2961_v52  ;;  %v3088_v52 = vld [vmem:[#allocation7 + $0x180] ss:$12 sps:$4 sm:$0xff]  }
  0xcf   :  { %1478 = vmatpush2.bf16.msra.mxu1 %v2964_v54  ;;  %1438 = vmatprep.subr.bf16.mxu0 %v2969_v55  ;;  %v3036_v54 = vld [vmem:[#allocation7 + $0x120] ss:$12 sps:$4 sm:$0xff]  }
  0xd0   :  { %1479 = vmatprep.subr.bf16.mxu1 %v2972_v56  ;;  %v3041_v55 = vld [vmem:[#allocation7 + $0x10c] ss:$12 sps:$4 sm:$0xff]   ;;  %v3091_v56 = vld [vmem:[#allocation7 + $0x2e8] ss:$12 sps:$4 sm:$0xff]  }
  0xd2   :  { %1439 = vmatpush2.bf16.msra.mxu0 %v2967_v57  ;;  %v3093_v57 = vld [vmem:[#allocation7 + $0x2ec] ss:$12 sps:$4 sm:$0xff]  }
  0xd3   :  { %1480 = vmatpush2.bf16.msra.mxu1 %v2970_v58  ;;  %1440 = vmatprep.subr.bf16.mxu0 %v2975_v59  ;;  %v3096_v58 = vld [vmem:[#allocation7 + $0x2d4] ss:$12 sps:$4 sm:$0xff]  }
  0xd4   :  { %1481 = vmatprep.subr.bf16.mxu1 %v2978_v60  ;;  %v3039_v59 = vld [vmem:[#allocation7 + $0x108] ss:$12 sps:$4 sm:$0xff]   ;;  %v3094_v60 = vld [vmem:[#allocation7 + $0x2d0] ss:$12 sps:$4 sm:$0xff]  }
  0xd6   :  { %1441 = vmatpush2.bf16.msra.mxu0 %v2973_v61  ;;  %v3044_v61 = vld [vmem:[#allocation7 + $0xf4] ss:$12 sps:$4 sm:$0xff]  }
  0xd7   :  { %1482 = vmatpush2.bf16.msra.mxu1 %v2976_v62  ;;  %1442 = vmatprep.subr.bf16.mxu0 %v2981_v63  ;;  %v3099_v62 = vld [vmem:[#allocation7 + $0x2bc] ss:$12 sps:$4 sm:$0xff]  }
  0xd8   :  { %1483 = vmatprep.subr.bf16.mxu1 %v2984_v0  ;;  %v3042_v63 = vld [vmem:[#allocation7 + $0xf0] ss:$12 sps:$4 sm:$0xff]   ;;  %v3097_v0 = vld [vmem:[#allocation7 + $0x2b8] ss:$12 sps:$4 sm:$0xff]  }
  0xda   :  { %1443 = vmatpush2.bf16.msra.mxu0 %v2979_v1  ;;  %v3047_v1 = vld [vmem:[#allocation7 + $0xdc] ss:$12 sps:$4 sm:$0xff]  }
  0xdb   :  { %1484 = vmatpush2.bf16.msra.mxu1 %v2982_v2  ;;  %1444 = vmatprep.subr.bf16.mxu0 %v2987_v3  ;;  %v3102_v2 = vld [vmem:[#allocation7 + $0x2a4] ss:$12 sps:$4 sm:$0xff]  }
  0xdc   :  { %1485 = vmatprep.subr.bf16.mxu1 %v2990_v4  ;;  %v3045_v3 = vld [vmem:[#allocation7 + $0xd8] ss:$12 sps:$4 sm:$0xff]   ;;  %v3100_v4 = vld [vmem:[#allocation7 + $0x2a0] ss:$12 sps:$4 sm:$0xff]  }
  0xde   :  { %1445 = vmatpush2.bf16.msra.mxu0 %v2985_v5  ;;  %v3050_v5 = vld [vmem:[#allocation7 + $0xc4] ss:$12 sps:$4 sm:$0xff]  }
  0xdf   :  { %1486 = vmatpush2.bf16.msra.mxu1 %v2988_v6  ;;  %1446 = vmatprep.subr.bf16.mxu0 %v2993_v7  ;;  %v3105_v6 = vld [vmem:[#allocation7 + $0x28c] ss:$12 sps:$4 sm:$0xff]  }
  0xe0   :  { %1487 = vmatprep.subr.bf16.mxu1 %v2996_v8  ;;  %v3048_v7 = vld [vmem:[#allocation7 + $0xc0] ss:$12 sps:$4 sm:$0xff]   ;;  %v3103_v8 = vld [vmem:[#allocation7 + $0x288] ss:$12 sps:$4 sm:$0xff]  }
  0xe2   :  { %1447 = vmatpush2.bf16.msra.mxu0 %v2991_v11  ;;  %v3051_v11 = vld [vmem:[#allocation7 + $0x170] ss:$12 sps:$4 sm:$0xff]  }
  0xe3   :  { %1488 = vmatpush2.bf16.msra.mxu1 %v2994_v12  ;;  %1448 = vmatprep.subr.bf16.mxu0 %v2999_v13  ;;  %v3108_v12 = vld [vmem:[#allocation7 + $0x274] ss:$12 sps:$4 sm:$0xff]   ;;  %v3106_v13 = vld [vmem:[#allocation7 + $0x270] ss:$12 sps:$4 sm:$0xff]  }
  0xe4   :  { %1489 = vmatprep.subr.bf16.mxu1 %v3002_v14 }
  0xe6   :  { %1449 = vmatpush2.bf16.msra.mxu0 %v2997_v15 }
  0xe7   :  { %1490 = vmatpush2.bf16.msra.mxu1 %v3000_v16  ;;  %2165 = vmatprep.subr.bf16.mxu0 %v3005_v18 }
  0xe8   :  { %2206 = vmatprep.subr.bf16.mxu1 %v3055_v27  ;;  %v3115_v27 = vld [vmem:[#allocation7 + $0x2f0] ss:$12 sps:$4 sm:$0xff]  }
  0xe9   :  { %1451 = vmatmul.mubr.bf16.vlgmr.msra.gmra.mxu0 %v3266_v10  ;;  %v3020_v10 = vld [vmem:[#allocation7 + $0x34] ss:$12 sps:$4 sm:$0xff]  }
  0xea   :  { %1492 = vmatmul.mubr.bf16.vlgmr.msra.gmra.mxu1 %v3274_v17  ;;  %2166 = vmatpush1.bf16.msra.mxu0 %v3003_v19  ;;  %v3060_v17 = vld [vmem:[#allocation7 + $0x214] ss:$12 sps:$4 sm:$0xff]   ;;  %v3111_v19 = vld [vmem:[#allocation7 + $0x25c] ss:$12 sps:$4 sm:$0xff]  }
  0xeb   :  { %2167 = vmatprep.subr.bf16.mxu0 %v3008_v20  ;;  %2207 = vmatpush1.bf16.msra.mxu1 %v3053_v28  ;;  %v3109_v20 = vld [vmem:[#allocation7 + $0x258] ss:$12 sps:$4 sm:$0xff]   ;;  %v274_v28 = vlaneseq }
  0xec   :  { %2208 = vmatprep.subr.bf16.mxu1 %v3060_v17  ;;  %v272_v17 = vld [vmem:[%s3311_s2] sm:$0xf] }
  0xee   :  { %2168 = vmatpush1.bf16.msra.mxu0 %v3006_v21 }
  0xef   :  { %2169 = vmatprep.subr.bf16.mxu0 %v3011_v22  ;;  %2209 = vmatpush1.bf16.msra.mxu1 %v3058_v9 }
  0xf0   :  { %2210 = vmatprep.subr.bf16.mxu1 %v3065_v32 }
  0xf2   :  { %2170 = vmatpush1.bf16.msra.mxu0 %v3009_v23 }
  0xf3   :  { %2171 = vmatprep.subr.bf16.mxu0 %v3014_v24  ;;  %2211 = vmatpush1.bf16.msra.mxu1 %v3063_v33 }
  0xf4   :  { %2212 = vmatprep.subr.bf16.mxu1 %v3070_v35 }
  0xf6   :  { %2172 = vmatpush1.bf16.msra.mxu0 %v3012_v25  ;;  %v3114_v25 = vld [vmem:[#allocation7 + $0x244] ss:$12 sps:$4 sm:$0xff]  }
  0xf7   :  { %2173 = vmatprep.subr.bf16.mxu0 %v3017_v26  ;;  %2213 = vmatpush1.bf16.msra.mxu1 %v3068_v36  ;;  %v3112_v26 = vld [vmem:[#allocation7 + $0x240] ss:$12 sps:$4 sm:$0xff]  }
  0xf8   :  { %2214 = vmatprep.subr.bf16.mxu1 %v3075_v39 }
  0xfa   :  { %2174 = vmatpush1.bf16.msra.mxu0 %v3015_v29  ;;  %v275_v29 = vshrl.u32 %v274_v28, 7  ;;  %v3118_v28 = vld [vmem:[#allocation7 + $0x218] ss:$12 sps:$4 sm:$0xff]  }
  0xfb   :  { %2175 = vmatprep.subr.bf16.mxu0 %v3020_v10  ;;  %2215 = vmatpush1.bf16.msra.mxu1 %v3073_v40 }
  0xfc   :  { %2216 = vmatprep.subr.bf16.mxu1 %v3080_v43  ;;  %v3282_v10 = vsub.s32 0, %v275_v29  ;;  %v3287_v9 = vsub.s32 1, %v275_v29 }
  0xfe   :  { %2176 = vmatpush1.bf16.msra.mxu0 %v3018_v30  ;;  %v277_v30 = vrot.slane %v272_v17, %v3282_v10 }
  0xff   :  { %2177 = vmatprep.subr.bf16.mxu0 %v3023_v31  ;;  %2217 = vmatpush1.bf16.msra.mxu1 %v3078_v44  ;;  %v281_v31 = vrot.slane %v272_v17, %v3287_v9 }
 0x100   :  { %2218 = vmatprep.subr.bf16.mxu1 %v3085_v47 }
 0x102   :  { %2178 = vmatpush1.bf16.msra.mxu0 %v3021_v53 }
 0x103   :  { %2179 = vmatprep.subr.bf16.mxu0 %v3026_v34  ;;  %2219 = vmatpush1.bf16.msra.mxu1 %v3083_v48  ;;  %v3052_v48 = vld [vmem:[#allocation7 + $0xb0] ss:$12 sps:$4 sm:$0xff]  }
 0x104   :  { %2220 = vmatprep.subr.bf16.mxu1 %v3090_v51  ;;  %v3057_v51 = vld [vmem:[#allocation7 + $0x98] ss:$12 sps:$4 sm:$0xff]  }
 0x106   :  { %2180 = vmatpush1.bf16.msra.mxu0 %v3024_v37 }
 0x107   :  { %2181 = vmatprep.subr.bf16.mxu0 %v3029_v38  ;;  %2221 = vmatpush1.bf16.msra.mxu1 %v3088_v52  ;;  %v3061_v52 = vld [vmem:[#allocation7 + $0x140] ss:$12 sps:$4 sm:$0xff]  }
 0x108   :  { %2222 = vmatprep.subr.bf16.mxu1 %v3093_v57  ;;  %v3071_v57 = vld [vmem:[#allocation7 + $0x110] ss:$12 sps:$4 sm:$0xff]  }
 0x10a   :  { %2182 = vmatpush2.bf16.msra.mxu0 %v3027_v41 }
 0x10b   :  { %2183 = vmatprep.subr.bf16.mxu0 %v3032_v42  ;;  %2223 = vmatpush2.bf16.msra.mxu1 %v3091_v56  ;;  %v3067_v56 = vld [vmem:[#allocation7 + $0x68] ss:$12 sps:$4 sm:$0xff]  }
 0x10c   :  { %2224 = vmatprep.subr.bf16.mxu1 %v3096_v58  ;;  %v3072_v58 = vld [vmem:[#allocation7 + $0x50] ss:$12 sps:$4 sm:$0xff]  }
 0x10e   :  { %2184 = vmatpush2.bf16.msra.mxu0 %v3030_v45 }
 0x10f   :  { %2185 = vmatprep.subr.bf16.mxu0 %v3035_v46  ;;  %2225 = vmatpush2.bf16.msra.mxu1 %v3094_v60  ;;  %v3077_v60 = vld [vmem:[#allocation7 + $0x38] ss:$12 sps:$4 sm:$0xff]  }
 0x110   :  { %2226 = vmatprep.subr.bf16.mxu1 %v3099_v62  ;;  %v3082_v62 = vld [vmem:[#allocation7 + $0x20] ss:$12 sps:$4 sm:$0xff]  }
 0x112   :  { %2186 = vmatpush2.bf16.msra.mxu0 %v3033_v49 }
 0x113   :  { %2187 = vmatprep.subr.bf16.mxu0 %v3038_v50  ;;  %2227 = vmatpush2.bf16.msra.mxu1 %v3097_v0  ;;  %v3056_v50 = vld [vmem:[#allocation7 + $0x158] ss:$12 sps:$4 sm:$0xff]   ;;  %v3087_v0 = vld [vmem:[#allocation7 + $0x8] ss:$12 sps:$4 sm:$0xff]  }
 0x114   :  { %2228 = vmatprep.subr.bf16.mxu1 %v3102_v2  ;;  %v288_v2 = vsub.s32 3, %v275_v29 }
 0x116   :  { %2188 = vmatpush2.bf16.msra.mxu0 %v3036_v54  ;;  %v3062_v54 = vld [vmem:[#allocation7 + $0x80] ss:$12 sps:$4 sm:$0xff]  }
 0x117   :  { %2189 = vmatprep.subr.bf16.mxu0 %v3041_v55  ;;  %2229 = vmatpush2.bf16.msra.mxu1 %v3100_v4  ;;  %v3066_v55 = vld [vmem:[#allocation7 + $0x128] ss:$12 sps:$4 sm:$0xff]   ;;  %v289_v4 = vrot.slane %v272_v17, %v288_v2 }
 0x118   :  { %2230 = vmatprep.subr.bf16.mxu1 %v3105_v6 }
 0x11a   :  { %2190 = vmatpush2.bf16.msra.mxu0 %v3039_v59  ;;  %v3076_v59 = vld [vmem:[#allocation7 + $0xf8] ss:$12 sps:$4 sm:$0xff]  }
 0x11b   :  { %2191 = vmatprep.subr.bf16.mxu0 %v3044_v61  ;;  %2231 = vmatpush2.bf16.msra.mxu1 %v3103_v8  ;;  %v3081_v61 = vld [vmem:[#allocation7 + $0xe0] ss:$12 sps:$4 sm:$0xff]  }
 0x11c   :  { %2232 = vmatprep.subr.bf16.mxu1 %v3108_v12 }
 0x11e   :  { %2192 = vmatpush2.bf16.msra.mxu0 %v3042_v63  ;;  %v3086_v63 = vld [vmem:[#allocation7 + $0xc8] ss:$12 sps:$4 sm:$0xff]  }
 0x11f   :  { %2193 = vmatprep.subr.bf16.mxu0 %v3047_v1  ;;  %2233 = vmatpush2.bf16.msra.mxu1 %v3106_v13  ;;  %v3291_v1 = vsub.s32 2, %v275_v29  ;;  %v3119_v29 = vld [vmem:[#allocation7 + $0x2c0] ss:$12 sps:$4 sm:$0xff]  }
 0x120   :  { %2234 = vmatprep.subr.bf16.mxu1 %v3111_v19 }
 0x122   :  { %2194 = vmatpush2.bf16.msra.mxu0 %v3045_v3  ;;  %v285_v3 = vrot.slane %v272_v17, %v3291_v1  ;;  %v3120_v17 = vld [vmem:[#allocation7 + $0x200] ss:$12 sps:$4 sm:$0xff]  }
 0x123   :  { %2195 = vmatprep.subr.bf16.mxu0 %v3050_v5  ;;  %2235 = vmatpush2.bf16.msra.mxu1 %v3109_v20 }
 0x124   :  { %2236 = vmatprep.subr.bf16.mxu1 %v3114_v25  ;;  %v3116_v25 = vld [vmem:[#allocation7 + $0x230] ss:$12 sps:$4 sm:$0xff]  }
 0x126   :  { %2196 = vmatpush2.bf16.msra.mxu0 %v3048_v7 }
 0x127   :  { %2664 = vmatprep.subr.bf16.mxu0 %v3051_v11  ;;  %2237 = vmatpush2.bf16.msra.mxu1 %v3112_v26 }
 0x128   :  { %2686 = vmatprep.subr.bf16.mxu1 %v3115_v27  ;;  %v3117_v27 = vld [vmem:[#allocation7 + $0x2d8] ss:$12 sps:$4 sm:$0xff]  }
 0x129   :  { %v1288_v14 = vpop.f32.mrf.mxu0 }
 0x12a   :  { %v1329_v15 = vpop.f32.mrf.mxu1  ;;  %v1289_v32 = vadd.f32 %v1288_v14, %v277_v30  ;;  %v3121_v30 = vld [vmem:[#allocation7 + $0x2a8] ss:$12 sps:$4 sm:$0xff]  }
 0x12b   :  { %v1290_v16 = vpop.f32.mrf.mxu0 }
 0x12c   :  { %v1331_v18 = vpop.f32.mrf.mxu1  ;;  %v1291_v33 = vadd.f32 %v1290_v16, %v281_v31  ;;  %v1330_v53 = vadd.f32 %v1329_v15, %v1289_v32  ;;  %v3122_v31 = vld [vmem:[#allocation7 + $0x1e8] ss:$12 sps:$4 sm:$0xff]   ;;  %v3123_v32 = vld [vmem:[#allocation7 + $0x290] ss:$12 sps:$4 sm:$0xff]  }
 0x12d   :  { %v1292_v21 = vpop.f32.mrf.mxu0 }
 0x12e   :  { %v1333_v22 = vpop.f32.mrf.mxu1  ;;  %v1332_v36 = vadd.f32 %v1331_v18, %v1291_v33  ;;  %v3124_v33 = vld [vmem:[#allocation7 + $0x1d0] ss:$12 sps:$4 sm:$0xff]  }
 0x12f   :  { %v1293_v23 = vpop.f32.mrf.mxu0 }
 0x130   :  { %v1334_v24 = vpop.f32.mrf.mxu1 }
 0x169   :  { %v1370_v34 = vpop.f32.mrf.mxu0 }
 0x16a   :  { %v1411_v35 = vpop.f32.mrf.mxu1  ;;  %v1371_v37 = vadd.f32 %v1370_v34, %v1330_v53  ;;  %v3125_v53 = vld [vmem:[#allocation7 + $0x278] ss:$12 sps:$4 sm:$0xff]  }
 0x16b   :  { %v1372_v38 = vpop.f32.mrf.mxu0  ;;  %v1412_v5 = vadd.f32 %v1411_v35, %v285_v3  ;;  %v3126_v34 = vld [vmem:[#allocation7 + $0x1b8] ss:$12 sps:$4 sm:$0xff]   ;;  %v3127_v35 = vld [vmem:[#allocation7 + $0x260] ss:$12 sps:$4 sm:$0xff]  }
 0x16c   :  { %v1413_v39 = vpop.f32.mrf.mxu1  ;;  %v1373_v40 = vadd.f32 %v1372_v38, %v1332_v36  ;;  %v1500_v41 = vmax.f32 %v1371_v37, 0.0  ;;  %v3128_v36 = vld [vmem:[#allocation7 + $0x1a0] ss:$12 sps:$4 sm:$0xff]   ;;  %v3129_v37 = vld [vmem:[#allocation7 + $0x248] ss:$12 sps:$4 sm:$0xff]  }
 0x16d   :  { %v1374_v42 = vpop.f32.mrf.mxu0  ;;  %v1414_v8 = vadd.f32 %v1413_v39, %v289_v4  ;;  %v3130_v38 = vld [vmem:[#allocation7 + $0x188] ss:$12 sps:$4 sm:$0xff]  }
 0x16e   :  { %v1415_v43 = vpop.f32.mrf.mxu1  ;;  %v1501_v44 = vmax.f32 %v1373_v40, 0.0  ;;  %v1504_v49 = vpack.c.bf16 %v1500_v41, %v1500_v41 }
 0x16f   :  { %v1375_v45 = vpop.f32.mrf.mxu0 }
 0x170   :  { %v1416_v46 = vpop.f32.mrf.mxu1  ;;  %v1505_v47 = vpack.c.bf16 %v1501_v44, %v1501_v44 }
 0x172   :  { %2197 = vmatprep.mubr.bf16.mxu0 %v1505_v47 }
 0x173   :  { %2198 = vmatmul.mubr.bf16.vlgmr.msra.gmra.mxu0 %v1504_v49 }
 0x174   :  { %2665 = vmatpush3.bf16.msra.mxu0 %v3052_v48  ;;  %2279 = vmatprep.mubr.bf16.mxu0 %v1505_v47  ;;  %v1636_v48 = vld [vmem:[%s3313_s4] sm:$0x7] }
 0x175   :  { %2666 = vmatprep.subr.bf16.mxu0 %v3056_v50  ;;  %v1645_v50 = vrot.slane %v1636_v48, %v3287_v9 }
 0x178   :  { %2667 = vmatpush3.bf16.msra.mxu0 %v3057_v51 }
 0x179   :  { %2668 = vmatprep.subr.bf16.mxu0 %v3061_v52 }
 0x17c   :  { %2669 = vmatpush3.bf16.msra.mxu0 %v3062_v54  ;;  %v2330_v54 = vld [vmem:[%s3314_s5] sm:$0x7] }
 0x17d   :  { %2670 = vmatprep.subr.bf16.mxu0 %v3066_v55 }
 0x180   :  { %2671 = vmatpush3.bf16.msra.mxu0 %v3067_v56 }
 0x181   :  { %2672 = vmatprep.subr.bf16.mxu0 %v3071_v57 }
 0x184   :  { %2673 = vmatpush3.bf16.msra.mxu0 %v3072_v58 }
 0x185   :  { %2674 = vmatprep.subr.bf16.mxu0 %v3076_v59  ;;  %v2335_v59 = vrot.slane %v2330_v54, %v3282_v10 }
 0x188   :  { %2675 = vmatpush3.bf16.msra.mxu0 %v3077_v60 }
 0x189   :  { %2676 = vmatprep.subr.bf16.mxu0 %v3081_v61  ;;  %v2339_v61 = vrot.slane %v2330_v54, %v3287_v9 }
 0x18c   :  { %2677 = vmatpush3.bf16.msra.mxu0 %v3082_v62 }
 0x18d   :  { %2678 = vmatprep.subr.bf16.mxu0 %v3086_v63 }
 0x190   :  { %2679 = vmatpush3.bf16.msra.mxu0 %v3087_v0 }
 0x193   :  { %2280 = vmatmul.mubr.bf16.vlgmr.msra.gmra.mxu0 %v1504_v49  ;;  %v1641_v49 = vrot.slane %v1636_v48, %v3282_v10 }
 0x1a9   :  { %v1452_v6 = vpop.f32.mrf.mxu0 }
 0x1aa   :  { %v1493_v7 = vpop.f32.mrf.mxu1  ;;  %v1453_v11 = vadd.f32 %v1452_v6, %v1412_v5  ;;  %v1649_v5 = vrot.slane %v1636_v48, %v3291_v1 }
 0x1ab   :  { %v1454_v12 = vpop.f32.mrf.mxu0 }
 0x1ac   :  { %v1495_v13 = vpop.f32.mrf.mxu1  ;;  %v1494_v14 = vadd.f32 %v1493_v7, %v1453_v11  ;;  %v1455_v15 = vadd.f32 %v1454_v12, %v1414_v8 }
 0x1ad   :  { %v1456_v16 = vpop.f32.mrf.mxu0 }
 0x1ae   :  { %v1497_v18 = vpop.f32.mrf.mxu1  ;;  %v1496_v19 = vadd.f32 %v1495_v13, %v1455_v15  ;;  %v1502_v20 = vmax.f32 %v1494_v14, 0.0  ;;  %v2343_v14 = vrot.slane %v2330_v54, %v3291_v1 }
 0x1af   :  { %v1457_v21 = vpop.f32.mrf.mxu0  ;;  %v2663_v18 = vld [vmem:[#allocation2] ss:$0 sm:$0xff] }
 0x1b0   :  { %v1498_v22 = vpop.f32.mrf.mxu1  ;;  %v1503_v23 = vmax.f32 %v1496_v19, 0.0  ;;  %v1506_v26 = vpack.c.bf16 %v1502_v20, %v1502_v20 }
 0x1b2   :  { %v1507_v24 = vpack.c.bf16 %v1503_v23, %v1503_v23 }
 0x1b4   :  { %2238 = vmatprep.mubr.bf16.mxu1 %v1507_v24 }
 0x1b5   :  { %2239 = vmatmul.mubr.bf16.vlgmr.msra.gmra.mxu1 %v1506_v26 }
 0x1b6   :  { %2687 = vmatpush3.bf16.msra.mxu1 %v3116_v25  ;;  %2319 = vmatprep.mubr.bf16.mxu1 %v1507_v24 }
 0x1b7   :  { %2688 = vmatprep.subr.bf16.mxu1 %v3117_v27 }
 0x1ba   :  { %2689 = vmatpush3.bf16.msra.mxu1 %v3118_v28 }
 0x1bb   :  { %2690 = vmatprep.subr.bf16.mxu1 %v3119_v29 }
 0x1be   :  { %2691 = vmatpush3.bf16.msra.mxu1 %v3120_v17 }
 0x1bf   :  { %2692 = vmatprep.subr.bf16.mxu1 %v3121_v30 }
 0x1c2   :  { %2693 = vmatpush3.bf16.msra.mxu1 %v3122_v31 }
 0x1c3   :  { %2694 = vmatprep.subr.bf16.mxu1 %v3123_v32 }
 0x1c6   :  { %2695 = vmatpush3.bf16.msra.mxu1 %v3124_v33 }
 0x1c7   :  { %2696 = vmatprep.subr.bf16.mxu1 %v3125_v53 }
 0x1ca   :  { %2697 = vmatpush3.bf16.msra.mxu1 %v3126_v34 }
 0x1cb   :  { %2698 = vmatprep.subr.bf16.mxu1 %v3127_v35 }
 0x1ce   :  { %2699 = vmatpush3.bf16.msra.mxu1 %v3128_v36 }
 0x1cf   :  { %2700 = vmatprep.subr.bf16.mxu1 %v3129_v37 }
 0x1d2   :  { %2701 = vmatpush3.bf16.msra.mxu1 %v3130_v38 }
 0x1d5   :  { %2320 = vmatmul.mubr.bf16.vlgmr.msra.gmra.mxu1 %v1506_v26 }
 0x233   :  { %v2199_v39 = vpop.f32.mrf.mxu0 }
 0x234   :  { %v2200_v51 = vadd.f32 %v2199_v39, %v1641_v49 }
 0x235   :  { %v2201_v40 = vpop.f32.mrf.mxu0 }
 0x236   :  { %v2202_v55 = vadd.f32 %v2201_v40, %v1645_v50 }
 0x237   :  { %v2203_v41 = vpop.f32.mrf.mxu0 }
 0x239   :  { %v2204_v42 = vpop.f32.mrf.mxu0 }
 0x253   :  { %v2680_v43 = vpop.f32.mrf.mxu0 }
 0x255   :  { %v2681_v44 = vpop.f32.mrf.mxu0 }
 0x256   :  { %v2682_v45 = vadd.f32 %v2681_v44, %v2680_v43 }
 0x257   :  { %v2683_v46 = vpop.f32.mrf.mxu0 }
 0x258   :  { %v2282_v8 = vadd.f32 %v2682_v45, %v1649_v5 }
 0x259   :  { %v2684_v47 = vpop.f32.mrf.mxu0 }
 0x275   :  { %v2240_v52 = vpop.f32.mrf.mxu1 }
 0x276   :  { %v2241_v56 = vadd.f32 %v2240_v52, %v2200_v51 }
 0x277   :  { %v2242_v57 = vpop.f32.mrf.mxu1 }
 0x278   :  { %v2327_v58 = vmax.f32 %v2241_v56, 0.0  ;;  %v2243_v60 = vadd.f32 %v2242_v57, %v2202_v55 }
 0x279   :  { %v2244_v62 = vpop.f32.mrf.mxu1 }
 0x27a   :  { %v2328_v63 = vmax.f32 %v2243_v60, 0.0  ;;  %v2347_v2 = vmul.f32 %v2335_v59, %v2327_v58 }
 0x27b   :  { %v2245_v0 = vpop.f32.mrf.mxu1 }
 0x27c   :  { %v2348_v3 = vmul.f32 %v2339_v61, %v2328_v63 }
 0x27e   :  { %v2350_v4 = vadd.f32 %v2348_v3, %v2347_v2 }
 0x295   :  { %v2702_v6 = vpop.f32.mrf.mxu1 }
 0x297   :  { %v2703_v7 = vpop.f32.mrf.mxu1 }
 0x298   :  { %v2704_v11 = vadd.f32 %v2703_v7, %v2702_v6 }
 0x299   :  { %v2705_v12 = vpop.f32.mrf.mxu1 }
 0x29a   :  { %v2322_v13 = vadd.f32 %v2704_v11, %v2282_v8 }
 0x29b   :  { %v2706_v10 = vpop.f32.mrf.mxu1 }
 0x29c   :  { %v2329_v15 = vmax.f32 %v2322_v13, 0.0 }
 0x29e   :  { %v2349_v16 = vmul.f32 %v2343_v14, %v2329_v15 }
 0x2a0   :  { %v2351_v9 = vadd.f32 %v2350_v4, %v2349_v16 }
 0x2a2   :  { %2352 = vadd.xlane.f32.xlu0 %v2351_v9 }
 0x32b   :  { %v2353_v19 = vpop.xlane.xlu0 %2352 }
 0x32c   :  { %v2361_v20 = vadd.f32 %v2663_v18, %v2353_v19 }
 0x32e   :  { %v2362_v21 = vsub.f32 0.0, %v2361_v20 }
 0x330   :  { %v2363_v22 = vmul.f32 1.442695, %v2362_v21 }
 0x332   :  { %3131 = vpow2.f32 %v2363_v22 }
 0x33f   :  { %v3132_v23 = vpop.eup %3131 }
 0x340   :  { %v2365_v24 = vadd.f32 1.0, %v3132_v23 }
 0x342   :  { %3133 = vrcp.f32 %v2365_v24 }
 0x34f   :  { %v3134_v25 = vpop.eup %3133 }
 0x350   :  { %2368 = vst.msk [vmem:[%s3316_s7] sm:$0xff] %vm2367_vm0, %v3134_v25 }
 0x351   :  { %2373 = vsyncpa [#allocation4], 1 }
 0x352   :  { %2374 = vsyncpa [#allocation6], 1 }

</bundles_post_ra>
